<compile_context>
chip_gen: v7x
topology: tpu7x:2x2x1
jax: 0.10.0
libtpu: 0.0.40
codegen_flags: <defaults>
</compile_context>

<pallas_src>
import jax
import jax.numpy as jnp
from jax.experimental import pallas as pl
from jax.experimental.pallas import tpu as pltpu

# ----- model dimensions (from DGL_Net.__init__) ------------------------------
F_IN, F_H1, F_H2, F_OUT = 1433, 256, 32, 7
F_IN_PAD = 1536                    # next multiple of 128
TK = 1536                          # K-tile; single reduction step at toy size.
                                   # For Cora-scale set TK=512 (grid=(3,)).
N_NODES = 128                      # small synthetic graph (Cora has 2708)


def _gcn_fused_kernel(a_ref, x_ref,
                      w1_ref, b1_ref,
                      w2_ref, b2_ref,
                      w3_ref, b3_ref,
                      o_ref, acc_ref):
    k = pl.program_id(0)

    # ---- layer-1 contraction, K-tiled: acc += X[:, k-tile] @ W1[k-tile, :] ---
    @pl.when(k == 0)
    def _():
        acc_ref[...] = jnp.zeros_like(acc_ref)

    acc_ref[...] += jnp.dot(x_ref[...], w1_ref[...],
                            preferred_element_type=jnp.float32)

    # ---- remaining (cheap) layers only on the last reduction step ------------
    @pl.when(k == pl.num_programs(0) - 1)
    def _():
        a = a_ref[...]                                   # (N, N), bf16

        # layer 1: relu( Â (X W1) + b1 )  -- bf16 MXU operands, f32 accumulate
        h1 = jnp.dot(a, acc_ref[...].astype(jnp.bfloat16),
                     preferred_element_type=jnp.float32) + b1_ref[...]
        h1 = jnp.maximum(h1, 0.0)

        # layer 2: relu( Â (h1 W2) + b2 )
        xw2 = jnp.dot(h1.astype(jnp.bfloat16), w2_ref[...],
                      preferred_element_type=jnp.float32)
        h2 = jnp.dot(a, xw2.astype(jnp.bfloat16),
                     preferred_element_type=jnp.float32) + b2_ref[...]
        h2 = jnp.maximum(h2, 0.0)

        # layer 3: Â (h2 W3) + b3   (no relu)
        xw3 = jnp.dot(h2.astype(jnp.bfloat16), w3_ref[...],
                      preferred_element_type=jnp.float32)
        h3 = jnp.dot(a, xw3.astype(jnp.bfloat16),
                     preferred_element_type=jnp.float32) + b3_ref[...]

        # log_softmax over dim=1 (class dimension), f32
        m = jnp.max(h3, axis=1, keepdims=True)
        s = h3 - m
        lse = jnp.log(jnp.sum(jnp.exp(s), axis=1, keepdims=True))
        o_ref[...] = s - lse


def dgl_net_forward(a_hat, feats, params):
    """params = (w1, b1, w2, b2, w3, b3); biases shaped (1, out).

    Padding of the contraction dim + bf16 casts of every MXU operand
    (Â, X, W1, W2, W3) happen here; biases and the kernel epilogue stay f32.
    """
    w1, b1, w2, b2, w3, b3 = params
    n = feats.shape[0]

    x_p = jnp.pad(feats, ((0, 0), (0, F_IN_PAD - F_IN))).astype(jnp.bfloat16)
    w1_p = jnp.pad(w1, ((0, F_IN_PAD - F_IN), (0, 0))).astype(jnp.bfloat16)
    a_bf = a_hat.astype(jnp.bfloat16)
    w2_bf = w2.astype(jnp.bfloat16)
    w3_bf = w3.astype(jnp.bfloat16)

    kt = F_IN_PAD // TK

    def resident(shape):
        # whole array resident in VMEM, same block for every grid step
        return pl.BlockSpec(shape, lambda k: tuple(0 for _ in shape))

    grid_spec = pltpu.PrefetchScalarGridSpec(
        num_scalar_prefetch=0,
        grid=(kt,),
        in_specs=[
            resident(a_bf.shape),                                # Â (bf16)
            pl.BlockSpec((n, TK), lambda k: (0, k)),             # X k-tile
            pl.BlockSpec((TK, F_H1), lambda k: (k, 0)),          # W1 k-tile
            resident(b1.shape),
            resident(w2_bf.shape), resident(b2.shape),
            resident(w3_bf.shape), resident(b3.shape),
        ],
        out_specs=pl.BlockSpec((n, F_OUT), lambda k: (0, 0)),
        scratch_shapes=[pltpu.VMEM((n, F_H1), jnp.float32)],     # X@W1 accumulator
    )

    return pl.pallas_call(
        _gcn_fused_kernel,
        out_shape=jax.ShapeDtypeStruct((n, F_OUT), jnp.float32),
        grid_spec=grid_spec,
        compiler_params=pltpu.CompilerParams(
            dimension_semantics=("arbitrary",),
            vmem_limit_bytes=16 << 20,
        ),
    )(a_bf, x_p, w1_p, b1, w2_bf, b2, w3_bf, b3)


def make_normalized_adjacency(key, n):
    """Symmetric random graph + self loops, Â = D^{-1/2}(A+I)D^{-1/2}."""
    r = jax.random.uniform(key, (n, n))
    upper = (r < 0.05).astype(jnp.float32)
    a = jnp.triu(upper, k=1)
    a = a + a.T + jnp.eye(n, dtype=jnp.float32)        # self loops, symmetric
    deg = jnp.sum(a, axis=1)
    d_inv_sqrt = 1.0 / jnp.sqrt(deg)
    return a * d_inv_sqrt[:, None] * d_inv_sqrt[None, :]


def glorot(key, shape):
    fan_in, fan_out = shape
    lim = jnp.sqrt(6.0 / (fan_in + fan_out))
    return jax.random.uniform(key, shape, jnp.float32, -lim, lim)


if __name__ == "__main__":
    key = jax.random.PRNGKey(0)
    k_adj, k_feat, k_w1, k_w2, k_w3 = jax.random.split(key, 5)

    a_hat = make_normalized_adjacency(k_adj, N_NODES)
    feats = jax.random.normal(k_feat, (N_NODES, F_IN), jnp.float32)

    # GraphConv params: Glorot weights, zero biases (DGL default init)
    w1 = glorot(k_w1, (F_IN, F_H1))
    w2 = glorot(k_w2, (F_H1, F_H2))
    w3 = glorot(k_w3, (F_H2, F_OUT))
    b1 = jnp.zeros((1, F_H1), jnp.float32)
    b2 = jnp.zeros((1, F_H2), jnp.float32)
    b3 = jnp.zeros((1, F_OUT), jnp.float32)
    params = (w1, b1, w2, b2, w3, b3)

    out = dgl_net_forward(a_hat, feats, params)
    out = jax.block_until_ready(out)

    # sanity check against a pure-JAX reference that mirrors the kernel's bf16
    # quantization of MXU operands (f32 accumulation), so only accumulation
    # order differs.
    def ref(a, x, p):
        w1, b1, w2, b2, w3, b3 = p
        bf = lambda t: t.astype(jnp.bfloat16)
        f32 = jnp.float32
        aq = bf(a)
        xw1 = jnp.dot(bf(x), bf(w1), preferred_element_type=f32)
        h1 = jnp.maximum(jnp.dot(aq, bf(xw1), preferred_element_type=f32) + b1, 0.0)
        xw2 = jnp.dot(bf(h1), bf(w2), preferred_element_type=f32)
        h2 = jnp.maximum(jnp.dot(aq, bf(xw2), preferred_element_type=f32) + b2, 0.0)
        xw3 = jnp.dot(bf(h2), bf(w3), preferred_element_type=f32)
        h3 = jnp.dot(aq, bf(xw3), preferred_element_type=f32) + b3
        return jax.nn.log_softmax(h3, axis=1)

    expected = ref(a_hat, feats, params)
    assert out.shape == (N_NODES, F_OUT)
    assert jnp.allclose(out, expected, atol=2e-3, rtol=2e-3)
    print("KERNEL_OK")
</pallas_src>

<mosaic_0001>
module attributes {stable_mosaic.version = 11 : i64} {
  func.func @_gcn_fused_kernel(%arg0: i32, %arg1: memref<128x128xbf16, #tpu.memory_space<vmem>>, %arg2: memref<128x1536xbf16, #tpu.memory_space<vmem>>, %arg3: memref<1536x256xbf16, #tpu.memory_space<vmem>>, %arg4: memref<1x256xf32, #tpu.memory_space<vmem>>, %arg5: memref<256x32xbf16, #tpu.memory_space<vmem>>, %arg6: memref<1x32xf32, #tpu.memory_space<vmem>>, %arg7: memref<32x7xbf16, #tpu.memory_space<vmem>>, %arg8: memref<1x7xf32, #tpu.memory_space<vmem>>, %arg9: memref<128x7xf32, #tpu.memory_space<vmem>>, %arg10: memref<128x256xf32, #tpu.memory_space<vmem>>) attributes {dimension_semantics = [#tpu.dimension_semantics<arbitrary>], iteration_bounds = array<i64: 1>, scalar_prefetch = 0 : i64, scratch_operands = 1 : i64, tpu.core_type = #tpu.core_type<tc>, window_params = [{pipeline_mode = #tpu.pipeline_mode<synchronous>, transform_indices = @transform_0, window_bounds = array<i64: 128, 128>}, {transform_indices = @transform_1, window_bounds = array<i64: 128, 1536>}, {transform_indices = @transform_2, window_bounds = array<i64: 1536, 256>}, {pipeline_mode = #tpu.pipeline_mode<synchronous>, transform_indices = @transform_3, window_bounds = array<i64: 1, 256>}, {pipeline_mode = #tpu.pipeline_mode<synchronous>, transform_indices = @transform_4, window_bounds = array<i64: 256, 32>}, {pipeline_mode = #tpu.pipeline_mode<synchronous>, transform_indices = @transform_5, window_bounds = array<i64: 1, 32>}, {pipeline_mode = #tpu.pipeline_mode<synchronous>, transform_indices = @transform_6, window_bounds = array<i64: 32, 7>}, {pipeline_mode = #tpu.pipeline_mode<synchronous>, transform_indices = @transform_7, window_bounds = array<i64: 1, 7>}, {pipeline_mode = #tpu.pipeline_mode<synchronous>, transform_indices = @transform_8, window_bounds = array<i64: 128, 7>}]} {
    %c0_i32 = arith.constant 0 : i32
    %0 = arith.cmpi eq, %arg0, %c0_i32 : i32
    %1 = arith.extui %0 : i1 to i32
    %c0_i32_0 = arith.constant 0 : i32
    %2 = arith.cmpi ne, %1, %c0_i32_0 : i32
    scf.if %2 {
      %cst_10 = arith.constant 0.000000e+00 : f32
      %12 = vector.broadcast %cst_10 : f32 to vector<128x256xf32>
      %c0_11 = arith.constant 0 : index
      %c0_12 = arith.constant 0 : index
      %13 = vector.load %arg10[%c0_11, %c0_12] : memref<128x256xf32, #tpu.memory_space<vmem>>, vector<128x256xf32>
      tpu.vector_store %arg10[%c0_11, %c0_12], %12 {strides = array<i32>} : memref<128x256xf32, #tpu.memory_space<vmem>>, vector<128x256xf32>,
    } else {
    }
    %c0 = arith.constant 0 : index
    %c0_1 = arith.constant 0 : index
    %3 = vector.load %arg10[%c0, %c0_1] : memref<128x256xf32, #tpu.memory_space<vmem>>, vector<128x256xf32>
    %c0_2 = arith.constant 0 : index
    %c0_3 = arith.constant 0 : index
    %4 = vector.load %arg2[%c0_2, %c0_3] : memref<128x1536xbf16, #tpu.memory_space<vmem>>, vector<128x1536xbf16>
    %c0_4 = arith.constant 0 : index
    %c0_5 = arith.constant 0 : index
    %5 = vector.load %arg3[%c0_4, %c0_5] : memref<1536x256xbf16, #tpu.memory_space<vmem>>, vector<1536x256xbf16>
    %cst = arith.constant dense<0.000000e+00> : vector<128x256xf32>
    %6 = tpu.matmul %4, %5, %cst {dimension_numbers = #tpu.dot_dimension_numbers<[1], [0], [0], [1], [0, 0, 1, 1], [], []>} : vector<128x1536xbf16>, vector<1536x256xbf16>, vector<128x256xf32> -> vector<128x256xf32>
    %7 = arith.addf %3, %6 : vector<128x256xf32>
    %c0_6 = arith.constant 0 : index
    %c0_7 = arith.constant 0 : index
    %8 = vector.load %arg10[%c0_6, %c0_7] : memref<128x256xf32, #tpu.memory_space<vmem>>, vector<128x256xf32>
    tpu.vector_store %arg10[%c0_6, %c0_7], %7 {strides = array<i32>} : memref<128x256xf32, #tpu.memory_space<vmem>>, vector<128x256xf32>,
    %c0_i32_8 = arith.constant 0 : i32
    %9 = arith.cmpi eq, %arg0, %c0_i32_8 : i32
    %10 = arith.extui %9 : i1 to i32
    %c0_i32_9 = arith.constant 0 : i32
    %11 = arith.cmpi ne, %10, %c0_i32_9 : i32
    scf.if %11 {
      %c0_10 = arith.constant 0 : index
      %c0_11 = arith.constant 0 : index
      %12 = vector.load %arg1[%c0_10, %c0_11] : memref<128x128xbf16, #tpu.memory_space<vmem>>, vector<128x128xbf16>
      %c0_12 = arith.constant 0 : index
      %c0_13 = arith.constant 0 : index
      %13 = vector.load %arg10[%c0_12, %c0_13] : memref<128x256xf32, #tpu.memory_space<vmem>>, vector<128x256xf32>
      %14 = arith.truncf %13 : vector<128x256xf32> to vector<128x256xbf16>
      %cst_14 = arith.constant dense<0.000000e+00> : vector<128x256xf32>
      %15 = tpu.matmul %12, %14, %cst_14 {dimension_numbers = #tpu.dot_dimension_numbers<[1], [0], [0], [1], [0, 0, 1, 1], [], []>} : vector<128x128xbf16>, vector<128x256xbf16>, vector<128x256xf32> -> vector<128x256xf32>
      %c0_15 = arith.constant 0 : index
      %c0_16 = arith.constant 0 : index
      %16 = vector.load %arg4[%c0_15, %c0_16] : memref<1x256xf32, #tpu.memory_space<vmem>>, vector<1x256xf32>
      %17 = vector.broadcast %16 : vector<1x256xf32> to vector<128x256xf32>
      %18 = arith.addf %15, %17 : vector<128x256xf32>
      %cst_17 = arith.constant 0.000000e+00 : f32
      %19 = vector.broadcast %cst_17 : f32 to vector<128x256xf32>
      %20 = arith.maximumf %18, %19 : vector<128x256xf32>
      %21 = arith.truncf %20 : vector<128x256xf32> to vector<128x256xbf16>
      %c0_18 = arith.constant 0 : index
      %c0_19 = arith.constant 0 : index
      %22 = vector.load %arg5[%c0_18, %c0_19] : memref<256x32xbf16, #tpu.memory_space<vmem>>, vector<256x32xbf16>
      %cst_20 = arith.constant dense<0.000000e+00> : vector<128x32xf32>
      %23 = tpu.matmul %21, %22, %cst_20 {dimension_numbers = #tpu.dot_dimension_numbers<[1], [0], [0], [1], [0, 0, 1, 1], [], []>} : vector<128x256xbf16>, vector<256x32xbf16>, vector<128x32xf32> -> vector<128x32xf32>
      %24 = arith.truncf %23 : vector<128x32xf32> to vector<128x32xbf16>
      %cst_21 = arith.constant dense<0.000000e+00> : vector<128x32xf32>
      %25 = tpu.matmul %12, %24, %cst_21 {dimension_numbers = #tpu.dot_dimension_numbers<[1], [0], [0], [1], [0, 0, 1, 1], [], []>} : vector<128x128xbf16>, vector<128x32xbf16>, vector<128x32xf32> -> vector<128x32xf32>
      %c0_22 = arith.constant 0 : index
      %c0_23 = arith.constant 0 : index
      %26 = vector.load %arg6[%c0_22, %c0_23] : memref<1x32xf32, #tpu.memory_space<vmem>>, vector<1x32xf32>
      %27 = vector.broadcast %26 : vector<1x32xf32> to vector<128x32xf32>
      %28 = arith.addf %25, %27 : vector<128x32xf32>
      %cst_24 = arith.constant 0.000000e+00 : f32
      %29 = vector.broadcast %cst_24 : f32 to vector<128x32xf32>
      %30 = arith.maximumf %28, %29 : vector<128x32xf32>
      %31 = arith.truncf %30 : vector<128x32xf32> to vector<128x32xbf16>
      %c0_25 = arith.constant 0 : index
      %c0_26 = arith.constant 0 : index
      %32 = vector.load %arg7[%c0_25, %c0_26] : memref<32x7xbf16, #tpu.memory_space<vmem>>, vector<32x7xbf16>
      %cst_27 = arith.constant dense<0.000000e+00> : vector<128x7xf32>
      %33 = tpu.matmul %31, %32, %cst_27 {dimension_numbers = #tpu.dot_dimension_numbers<[1], [0], [0], [1], [0, 0, 1, 1], [], []>} : vector<128x32xbf16>, vector<32x7xbf16>, vector<128x7xf32> -> vector<128x7xf32>
      %34 = arith.truncf %33 : vector<128x7xf32> to vector<128x7xbf16>
      %cst_28 = arith.constant dense<0.000000e+00> : vector<128x7xf32>
      %35 = tpu.matmul %12, %34, %cst_28 {dimension_numbers = #tpu.dot_dimension_numbers<[1], [0], [0], [1], [0, 0, 1, 1], [], []>} : vector<128x128xbf16>, vector<128x7xbf16>, vector<128x7xf32> -> vector<128x7xf32>
      %c0_29 = arith.constant 0 : index
      %c0_30 = arith.constant 0 : index
      %36 = vector.load %arg8[%c0_29, %c0_30] : memref<1x7xf32, #tpu.memory_space<vmem>>, vector<1x7xf32>
      %37 = vector.broadcast %36 : vector<1x7xf32> to vector<128x7xf32>
      %38 = arith.addf %35, %37 : vector<128x7xf32>
      %cst_31 = arith.constant dense<0xFF800000> : vector<128xf32>
      %39 = vector.multi_reduction <maximumf>, %38, %cst_31 [1] : vector<128x7xf32> to vector<128xf32>
      %40 = vector.shape_cast %39 : vector<128xf32> to vector<128x1xf32>
      %41 = vector.broadcast %40 : vector<128x1xf32> to vector<128x7xf32>
      %42 = arith.subf %38, %41 : vector<128x7xf32>
      %43 = math.exp %42 : vector<128x7xf32>
      %cst_32 = arith.constant dense<0.000000e+00> : vector<128xf32>
      %44 = vector.multi_reduction <add>, %43, %cst_32 [1] : vector<128x7xf32> to vector<128xf32>
      %45 = vector.shape_cast %44 : vector<128xf32> to vector<128x1xf32>
      %46 = math.log %45 : vector<128x1xf32>
      %47 = vector.broadcast %46 : vector<128x1xf32> to vector<128x7xf32>
      %48 = arith.subf %42, %47 : vector<128x7xf32>
      %c0_33 = arith.constant 0 : index
      %c0_34 = arith.constant 0 : index
      %49 = vector.load %arg9[%c0_33, %c0_34] : memref<128x7xf32, #tpu.memory_space<vmem>>, vector<128x7xf32>
      tpu.vector_store %arg9[%c0_33, %c0_34], %48 {strides = array<i32>} : memref<128x7xf32, #tpu.memory_space<vmem>>, vector<128x7xf32>,
    } else {
    }
    return
  }
  func.func @transform_0(%arg0: i32) -> (i32, i32) {
    %c0_i32 = arith.constant 0 : i32
    %c0_i32_0 = arith.constant 0 : i32
    %c0_i32_1 = arith.constant 0 : i32
    return %c0_i32, %c0_i32_0 : i32, i32
  }
  func.func @transform_1(%arg0: i32) -> (i32, i32) {
    %c0_i32 = arith.constant 0 : i32
    %c0_i32_0 = arith.constant 0 : i32
    return %c0_i32, %arg0 : i32, i32
  }
  func.func @transform_2(%arg0: i32) -> (i32, i32) {
    %c0_i32 = arith.constant 0 : i32
    %c0_i32_0 = arith.constant 0 : i32
    return %arg0, %c0_i32 : i32, i32
  }
  func.func @transform_3(%arg0: i32) -> (i32, i32) {
    %c0_i32 = arith.constant 0 : i32
    %c0_i32_0 = arith.constant 0 : i32
    %c0_i32_1 = arith.constant 0 : i32
    return %c0_i32, %c0_i32_0 : i32, i32
  }
  func.func @transform_4(%arg0: i32) -> (i32, i32) {
    %c0_i32 = arith.constant 0 : i32
    %c0_i32_0 = arith.constant 0 : i32
    %c0_i32_1 = arith.constant 0 : i32
    return %c0_i32, %c0_i32_0 : i32, i32
  }
  func.func @transform_5(%arg0: i32) -> (i32, i32) {
    %c0_i32 = arith.constant 0 : i32
    %c0_i32_0 = arith.constant 0 : i32
    %c0_i32_1 = arith.constant 0 : i32
    return %c0_i32, %c0_i32_0 : i32, i32
  }
  func.func @transform_6(%arg0: i32) -> (i32, i32) {
    %c0_i32 = arith.constant 0 : i32
    %c0_i32_0 = arith.constant 0 : i32
    %c0_i32_1 = arith.constant 0 : i32
    return %c0_i32, %c0_i32_0 : i32, i32
  }
  func.func @transform_7(%arg0: i32) -> (i32, i32) {
    %c0_i32 = arith.constant 0 : i32
    %c0_i32_0 = arith.constant 0 : i32
    %c0_i32_1 = arith.constant 0 : i32
    return %c0_i32, %c0_i32_0 : i32, i32
  }
  func.func @transform_8(%arg0: i32) -> (i32, i32) {
    %c0_i32 = arith.constant 0 : i32
    %c0_i32_0 = arith.constant 0 : i32
    %c0_i32_1 = arith.constant 0 : i32
    return %c0_i32, %c0_i32_0 : i32, i32
  }
}

</mosaic_0001>

<bundles_post_ra>
// kernel: tpu_custom_call.1
= control target key start
LH: loop header
LB: loop body
LE: loop exit
PB: predicated region body
PF: predicated region fallthrough
CT: control target
= control target key end

     0   :  { %13 = vsyncpa [#allocation4], 0  ;;  %s5488_s0 = inlined_call_operand.vmem [shape: bf16[128,128], index: 0, kind: input, shape index: {}]   ;;  %s5489_s1 = inlined_call_operand.hbm [shape: bf16[128,1536], index: 1, kind: input, shape index: {}]   ;;  %s5490_s2 = inlined_call_operand.hbm [shape: bf16[1536,256], index: 2, kind: input, shape index: {}]   ;;  %s5491_s3 = inlined_call_operand.vmem [shape: f32[1,256], index: 3, kind: input, shape index: {}]   ;;  %s5492_s4 = inlined_call_operand.vmem [shape: bf16[256,32], index: 4, kind: input, shape index: {}]   ;;  %s5493_s5 = inlined_call_operand.vmem [shape: f32[1,32], index: 5, kind: input, shape index: {}]   ;;  %s5494_s6 = inlined_call_operand.vmem [shape: bf16[32,7], index: 6, kind: input, shape index: {}]   ;;  %s5495_s7 = inlined_call_operand.vmem [shape: f32[1,7], index: 7, kind: input, shape index: {}]   ;;  %s5496_s8 = inlined_call_operand.vmem [shape: f32[128,7], index: 8, kind: output, shape index: {}]  }
   0x1   :  { %14 = vsyncpa [#allocation6], 0  ;;  %s4961_s27 = smov [#allocation3]   ;;  %s4913_s9 = scalar_lea.hbm %s5489_s1, 12288 }
   0x2   :  { %s22_s28 = sshll.u32 %s4961_s27, 4  ;;  %p4914_p0 = scmp.ne.s32.totalorder %s5489_s1, %s4913_s9  ;;  %s23_s28 = int_to_ptr.vmem [resolvable:$true] %s22_s28 }
   0x3   :  { %p4917_p1 = scmp.lt.u32.totalorder %s4913_s9, %s5489_s1 }
   0x5   :  { %p4919_p2 = pnand %p4917_p1, %p4914_p0 }
   0x7   :  { %4922 = shalt.err (!%p4919_p2)
}
   0x8   :  { %s4923_s14 = scalar_lea.vmem %s23_s28, 12288  ;;  %p4928_p4 = scmp.lt.s32.totalorder %s23_s28, %s23_s28 }
   0x9   :  { %p4924_p3 = scmp.ne.s32.totalorder %s23_s28, %s4923_s14  ;;  %p4929_p5 = scmp.lt.s32.totalorder %s4923_s14, %s4923_s14 }
   0xb   :  { %p4930_p6 = por %p4929_p5, %p4928_p4 }
   0xd   :  { %p4931_p7 = pnand %p4930_p6, %p4924_p3 }
   0xf   :  { %4934 = shalt.err (!%p4931_p7)
}
  0x10   :  { %s4962_s15 = smov 768   ;;  %s4963_s16 = smov 48  }
  0x11   :  { %28 = dma.hbm_to_vmem [thread:$0]  %s5489_s1, 12288, %s23_s28, [#allocation4], %s4962_s15, %s4962_s15, %s4963_s16  }
  0x12   :  { %s4964_s19 = smov [#allocation5]   ;;  %s4935_s23 = scalar_lea.hbm %s5490_s2, 24576 }
  0x13   :  { %s34_s20 = sshll.u32 %s4964_s19, 4  ;;  %p4936_p8 = scmp.ne.s32.totalorder %s5490_s2, %s4935_s23  ;;  %s35_s20 = int_to_ptr.vmem [resolvable:$true] %s34_s20 }
  0x14   :  { %p4939_p9 = scmp.lt.u32.totalorder %s4935_s23, %s5490_s2 }
  0x16   :  { %p4941_p10 = pnand %p4939_p9, %p4936_p8 }
  0x18   :  { %4944 = shalt.err (!%p4941_p10)
}
  0x19   :  { %s4945_s29 = scalar_lea.vmem %s35_s20, 24576  ;;  %p4950_p12 = scmp.lt.s32.totalorder %s35_s20, %s35_s20 }
  0x1a   :  { %p4946_p11 = scmp.ne.s32.totalorder %s35_s20, %s4945_s29  ;;  %p4951_p13 = scmp.lt.s32.totalorder %s4945_s29, %s4945_s29 }
  0x1c   :  { %p4952_p0 = por %p4951_p13, %p4950_p12 }
  0x1e   :  { %p4953_p1 = pnand %p4952_p0, %p4946_p11 }
  0x20   :  { %4956 = shalt.err (!%p4953_p1)
}
  0x21   :  { %s4965_s1 = smov 128   ;;  %s4966_s28 = smov 8  }
  0x22   :  { %40 = dma.hbm_to_vmem [thread:$0]  %s5490_s2, 24576, %s35_s20, [#allocation6], %s4965_s1, %s4965_s1, %s4966_s28  }
  0x23   :  { %4957 = dma.done.wait [#allocation4], 12288  }
  0x24   :  { %4958 = vsyncadd [#allocation4], 4294955008 }
  0x25   :  { %4959 = dma.done.wait [#allocation6], 24576  }
  0x26   :  { %4960 = vsyncadd [#allocation6], 4294942720  ;;  %v4391_v0 = vld [vmem:[#allocation5 + $0x104] ss:$8 sps:$4 sm:$0xff]   ;;  %v4393_v1 = vld [vmem:[#allocation5 + $0x100] ss:$8 sps:$4 sm:$0xff]  }
  0x27   :  { %1967 = vmatprep.subr.bf16.mxu0 %v4391_v0  ;;  %v4394_v2 = vld [vmem:[#allocation5 + $0x114] ss:$8 sps:$4 sm:$0xff]   ;;  %v4396_v3 = vld [vmem:[#allocation5 + $0x110] ss:$8 sps:$4 sm:$0xff]   ;;  %v4397_v4 = vld [vmem:[#allocation5 + $0x124] ss:$8 sps:$4 sm:$0xff]  }
  0x28   :  { %1968 = vmatpush1.bf16.msra.mxu0 %v4393_v1  ;;  %v4399_v5 = vld [vmem:[#allocation5 + $0x120] ss:$8 sps:$4 sm:$0xff]   ;;  %v4400_v6 = vld [vmem:[#allocation5 + $0x134] ss:$8 sps:$4 sm:$0xff]   ;;  %v4402_v7 = vld [vmem:[#allocation5 + $0x130] ss:$8 sps:$4 sm:$0xff]  }
  0x29   :  { %1969 = vmatprep.subr.bf16.mxu0 %v4394_v2  ;;  %v4403_v8 = vld [vmem:[#allocation5 + $0x144] ss:$8 sps:$4 sm:$0xff]   ;;  %v4405_v9 = vld [vmem:[#allocation5 + $0x140] ss:$8 sps:$4 sm:$0xff]   ;;  %v4406_v10 = vld [vmem:[#allocation5 + $0x154] ss:$8 sps:$4 sm:$0xff]  }
  0x2a   :  { %v4408_v11 = vld [vmem:[#allocation5 + $0x150] ss:$8 sps:$4 sm:$0xff]   ;;  %v4409_v12 = vld [vmem:[#allocation5 + $0x164] ss:$8 sps:$4 sm:$0xff]   ;;  %v4411_v14 = vld [vmem:[#allocation5 + $0x160] ss:$8 sps:$4 sm:$0xff]  }
  0x2b   :  { %v4441_v13 = vld [vmem:[#allocation3 + $0xc] ss:$48 sps:$4 sm:$0xff]   ;;  %v4414_v16 = vld [vmem:[#allocation5 + $0x170] ss:$8 sps:$4 sm:$0xff]   ;;  %v4417_v18 = vld [vmem:[#allocation5 + $0x180] ss:$8 sps:$4 sm:$0xff]  }
  0x2c   :  { %1970 = vmatpush1.bf16.msra.mxu0 %v4396_v3  ;;  %v4412_v15 = vld [vmem:[#allocation5 + $0x174] ss:$8 sps:$4 sm:$0xff]   ;;  %1999 = vmatprep.mubr.bf16.mxu0 %v4441_v13  ;;  %v4415_v17 = vld [vmem:[#allocation5 + $0x184] ss:$8 sps:$4 sm:$0xff]   ;;  %v4420_v20 = vld [vmem:[#allocation5 + $0x190] ss:$8 sps:$4 sm:$0xff]  }
  0x2d   :  { %1971 = vmatprep.subr.bf16.mxu0 %v4397_v4  ;;  %v4418_v19 = vld [vmem:[#allocation5 + $0x194] ss:$8 sps:$4 sm:$0xff]   ;;  %v4421_v21 = vld [vmem:[#allocation5 + $0x1a4] ss:$8 sps:$4 sm:$0xff]   ;;  %v4423_v22 = vld [vmem:[#allocation5 + $0x1a0] ss:$8 sps:$4 sm:$0xff]  }
  0x2e   :  { %v4424_v23 = vld [vmem:[#allocation5 + $0x1b4] ss:$8 sps:$4 sm:$0xff]   ;;  %v4426_v24 = vld [vmem:[#allocation5 + $0x1b0] ss:$8 sps:$4 sm:$0xff]   ;;  %v4427_v25 = vld [vmem:[#allocation5 + $0x1c4] ss:$8 sps:$4 sm:$0xff]  }
  0x2f   :  { %v4429_v26 = vld [vmem:[#allocation5 + $0x1c0] ss:$8 sps:$4 sm:$0xff]   ;;  %v4430_v27 = vld [vmem:[#allocation5 + $0x1d4] ss:$8 sps:$4 sm:$0xff]   ;;  %v4432_v28 = vld [vmem:[#allocation5 + $0x1d0] ss:$8 sps:$4 sm:$0xff]  }
  0x30   :  { %1972 = vmatpush1.bf16.msra.mxu0 %v4399_v5  ;;  %v4433_v29 = vld [vmem:[#allocation5 + $0x1e4] ss:$8 sps:$4 sm:$0xff]   ;;  %v4435_v30 = vld [vmem:[#allocation5 + $0x1e0] ss:$8 sps:$4 sm:$0xff]   ;;  %v4436_v31 = vld [vmem:[#allocation5 + $0x1f4] ss:$8 sps:$4 sm:$0xff]  }
  0x31   :  { %1973 = vmatprep.subr.bf16.mxu0 %v4400_v6  ;;  %v4438_v32 = vld [vmem:[#allocation5 + $0x1f0] ss:$8 sps:$4 sm:$0xff]   ;;  %v4444_v33 = vld [vmem:[#allocation5 + $0x204] ss:$8 sps:$4 sm:$0xff]   ;;  %v4442_v35 = vld [vmem:[#allocation5 + $0x200] ss:$8 sps:$4 sm:$0xff]  }
  0x32   :  { %v4439_v34 = vld [vmem:[#allocation3 + $0x8] ss:$48 sps:$4 sm:$0xff]   ;;  %v4448_v36 = vld [vmem:[#allocation3 + $0x6c] ss:$48 sps:$4 sm:$0xff]   ;;  %vm3261_vm0 = vcmask 261120   ;;  %vm3495_vm1 = vcmask 56320  }
  0x33   :  { %v4447_v37 = vld [vmem:[#allocation5 + $0x214] ss:$8 sps:$4 sm:$0xff]   ;;  %v4445_v38 = vld [vmem:[#allocation5 + $0x210] ss:$8 sps:$4 sm:$0xff]   ;;  %v4453_v39 = vld [vmem:[#allocation5 + $0x224] ss:$8 sps:$4 sm:$0xff]  }
  0x34   :  { %1974 = vmatpush1.bf16.msra.mxu0 %v4402_v7  ;;  %v4450_v40 = vld [vmem:[#allocation3 + $0x68] ss:$48 sps:$4 sm:$0xff]   ;;  %v4457_v42 = vld [vmem:[#allocation3 + $0xcc] ss:$48 sps:$4 sm:$0xff]  }
  0x35   :  { %1975 = vmatprep.subr.bf16.mxu0 %v4403_v8  ;;  %v4451_v41 = vld [vmem:[#allocation5 + $0x220] ss:$8 sps:$4 sm:$0xff]   ;;  %v4456_v43 = vld [vmem:[#allocation5 + $0x234] ss:$8 sps:$4 sm:$0xff]   ;;  %v4454_v44 = vld [vmem:[#allocation5 + $0x230] ss:$8 sps:$4 sm:$0xff]  }
  0x36   :  { %v4462_v45 = vld [vmem:[#allocation5 + $0x244] ss:$8 sps:$4 sm:$0xff]   ;;  %v4459_v46 = vld [vmem:[#allocation3 + $0xc8] ss:$48 sps:$4 sm:$0xff]   ;;  %v4465_v49 = vld [vmem:[#allocation5 + $0x254] ss:$8 sps:$4 sm:$0xff]  }
  0x37   :  { %v4460_v47 = vld [vmem:[#allocation5 + $0x240] ss:$8 sps:$4 sm:$0xff]   ;;  %v4466_v48 = vld [vmem:[#allocation3 + $0x12c] ss:$48 sps:$4 sm:$0xff]   ;;  %v4463_v50 = vld [vmem:[#allocation5 + $0x250] ss:$8 sps:$4 sm:$0xff]  }
  0x38   :  { %1976 = vmatpush1.bf16.msra.mxu0 %v4405_v9  ;;  %v4471_v51 = vld [vmem:[#allocation5 + $0x264] ss:$8 sps:$4 sm:$0xff]   ;;  %v4468_v52 = vld [vmem:[#allocation3 + $0x128] ss:$48 sps:$4 sm:$0xff]   ;;  %v4474_v55 = vld [vmem:[#allocation5 + $0x274] ss:$8 sps:$4 sm:$0xff]  }
  0x39   :  { %1977 = vmatprep.subr.bf16.mxu0 %v4406_v10  ;;  %v4469_v53 = vld [vmem:[#allocation5 + $0x260] ss:$8 sps:$4 sm:$0xff]   ;;  %v4475_v54 = vld [vmem:[#allocation3 + $0x18c] ss:$48 sps:$4 sm:$0xff]   ;;  %v4472_v56 = vld [vmem:[#allocation5 + $0x270] ss:$8 sps:$4 sm:$0xff]  }
  0x3a   :  { %v4480_v57 = vld [vmem:[#allocation5 + $0x284] ss:$8 sps:$4 sm:$0xff]   ;;  %v4477_v58 = vld [vmem:[#allocation3 + $0x188] ss:$48 sps:$4 sm:$0xff]   ;;  %v4483_v61 = vld [vmem:[#allocation5 + $0x294] ss:$8 sps:$4 sm:$0xff]  }
  0x3b   :  { %v4478_v59 = vld [vmem:[#allocation5 + $0x280] ss:$8 sps:$4 sm:$0xff]   ;;  %v4484_v60 = vld [vmem:[#allocation3 + $0x1ec] ss:$48 sps:$4 sm:$0xff]   ;;  %v4481_v62 = vld [vmem:[#allocation5 + $0x290] ss:$8 sps:$4 sm:$0xff]  }
  0x3c   :  { %1978 = vmatpush1.bf16.msra.mxu0 %v4408_v11  ;;  %v4489_v63 = vld [vmem:[#allocation5 + $0x2a4] ss:$8 sps:$4 sm:$0xff]   ;;  %v4486_v0 = vld [vmem:[#allocation3 + $0x1e8] ss:$48 sps:$4 sm:$0xff]   ;;  %v4492_v3 = vld [vmem:[#allocation5 + $0x2b4] ss:$8 sps:$4 sm:$0xff]  }
  0x3d   :  { %1979 = vmatprep.subr.bf16.mxu0 %v4409_v12  ;;  %v4487_v1 = vld [vmem:[#allocation5 + $0x2a0] ss:$8 sps:$4 sm:$0xff]   ;;  %v4493_v2 = vld [vmem:[#allocation3 + $0x24c] ss:$48 sps:$4 sm:$0xff]   ;;  %v4490_v4 = vld [vmem:[#allocation5 + $0x2b0] ss:$8 sps:$4 sm:$0xff]  }
  0x3e   :  { %v4498_v5 = vld [vmem:[#allocation5 + $0x2c4] ss:$8 sps:$4 sm:$0xff]   ;;  %v4495_v6 = vld [vmem:[#allocation3 + $0x248] ss:$48 sps:$4 sm:$0xff]   ;;  %v4501_v9 = vld [vmem:[#allocation5 + $0x2d4] ss:$8 sps:$4 sm:$0xff]  }
  0x3f   :  { %v4496_v7 = vld [vmem:[#allocation5 + $0x2c0] ss:$8 sps:$4 sm:$0xff]   ;;  %v4502_v8 = vld [vmem:[#allocation3 + $0x2ac] ss:$48 sps:$4 sm:$0xff]   ;;  %v4499_v10 = vld [vmem:[#allocation5 + $0x2d0] ss:$8 sps:$4 sm:$0xff]  }
  0x40   :  { %1980 = vmatpush1.bf16.msra.mxu0 %v4411_v14  ;;  %v4507_v11 = vld [vmem:[#allocation5 + $0x2e4] ss:$8 sps:$4 sm:$0xff]   ;;  %v4504_v12 = vld [vmem:[#allocation3 + $0x2a8] ss:$48 sps:$4 sm:$0xff]  }
  0x41   :  { %1981 = vmatprep.subr.bf16.mxu0 %v4412_v15  ;;  %v4505_v13 = vld [vmem:[#allocation5 + $0x2e0] ss:$8 sps:$4 sm:$0xff]   ;;  %v4513_v14 = vld [vmem:[#allocation3 + $0x14] ss:$48 sps:$4 sm:$0xff]  }
  0x42   :  { %v4510_v15 = vld [vmem:[#allocation5 + $0x2f4] ss:$8 sps:$4 sm:$0xff]  }
  0x44   :  { %1982 = vmatpush1.bf16.msra.mxu0 %v4414_v16  ;;  %v4508_v16 = vld [vmem:[#allocation5 + $0x2f0] ss:$8 sps:$4 sm:$0xff]  }
  0x45   :  { %1983 = vmatprep.subr.bf16.mxu0 %v4415_v17  ;;  %v4516_v17 = vld [vmem:[#allocation5 + $0x304] ss:$8 sps:$4 sm:$0xff]  }
  0x48   :  { %1984 = vmatpush1.bf16.msra.mxu0 %v4417_v18  ;;  %v4511_v18 = vld [vmem:[#allocation3 + $0x10] ss:$48 sps:$4 sm:$0xff]  }
  0x49   :  { %1985 = vmatprep.subr.bf16.mxu0 %v4418_v19  ;;  %v4655_v19 = vld [vmem:[#allocation5 + $0x4] ss:$8 sps:$4 sm:$0xff]  }
  0x4a   :  { %1854 = vmatprep.subr.bf16.mxu1 %v4655_v19  ;;  %v4573_v19 = vld [vmem:[#allocation5 + $0x3d4] ss:$8 sps:$4 sm:$0xff]  }
  0x4c   :  { %1986 = vmatpush1.bf16.msra.mxu0 %v4420_v20  ;;  %v4657_v20 = vld [vmem:[#allocation5] ss:$8 sps:$4 sm:$0xff]  }
  0x4d   :  { %1987 = vmatprep.subr.bf16.mxu0 %v4421_v21  ;;  %v4514_v21 = vld [vmem:[#allocation5 + $0x300] ss:$8 sps:$4 sm:$0xff]   ;;  %1855 = vmatpush1.bf16.msra.mxu1 %v4657_v20  ;;  %v4754_v20 = vld [vmem:[#allocation5 + $0xd4] ss:$8 sps:$4 sm:$0xff]  }
  0x50   :  { %1988 = vmatpush1.bf16.msra.mxu0 %v4423_v22  ;;  %v4520_v22 = vld [vmem:[#allocation3 + $0x74] ss:$48 sps:$4 sm:$0xff]  }
  0x51   :  { %1989 = vmatprep.subr.bf16.mxu0 %v4424_v23  ;;  %v4519_v23 = vld [vmem:[#allocation5 + $0x314] ss:$8 sps:$4 sm:$0xff]  }
  0x54   :  { %1990 = vmatpush1.bf16.msra.mxu0 %v4426_v24  ;;  %v4664_v24 = vld [vmem:[#allocation5 + $0x14] ss:$8 sps:$4 sm:$0xff]  }
  0x55   :  { %1991 = vmatprep.subr.bf16.mxu0 %v4427_v25  ;;  %v4666_v25 = vld [vmem:[#allocation5 + $0x10] ss:$8 sps:$4 sm:$0xff]   ;;  %1856 = vmatprep.subr.bf16.mxu1 %v4664_v24 }
  0x56   :  { %1857 = vmatpush1.bf16.msra.mxu1 %v4666_v25  ;;  %v4576_v24 = vld [vmem:[#allocation3 + $0x2b0] ss:$48 sps:$4 sm:$0xff]   ;;  %v4760_v25 = vld [vmem:[#allocation5 + $0xe4] ss:$8 sps:$4 sm:$0xff]  }
  0x58   :  { %1992 = vmatpush1.bf16.msra.mxu0 %v4429_v26  ;;  %v4517_v26 = vld [vmem:[#allocation5 + $0x310] ss:$8 sps:$4 sm:$0xff]  }
  0x59   :  { %1993 = vmatprep.subr.bf16.mxu0 %v4430_v27  ;;  %v4525_v27 = vld [vmem:[#allocation5 + $0x324] ss:$8 sps:$4 sm:$0xff]  }
  0x5c   :  { %1994 = vmatpush1.bf16.msra.mxu0 %v4432_v28  ;;  %v4522_v28 = vld [vmem:[#allocation3 + $0x70] ss:$48 sps:$4 sm:$0xff]  }
  0x5d   :  { %1995 = vmatprep.subr.bf16.mxu0 %v4433_v29  ;;  %v4670_v29 = vld [vmem:[#allocation5 + $0x24] ss:$8 sps:$4 sm:$0xff]  }
  0x5e   :  { %1858 = vmatprep.subr.bf16.mxu1 %v4670_v29  ;;  %v4582_v29 = vld [vmem:[#allocation5 + $0x3f4] ss:$8 sps:$4 sm:$0xff]  }
  0x60   :  { %1996 = vmatpush1.bf16.msra.mxu0 %v4435_v30  ;;  %v4672_v30 = vld [vmem:[#allocation5 + $0x20] ss:$8 sps:$4 sm:$0xff]  }
  0x61   :  { %1997 = vmatprep.subr.bf16.mxu0 %v4436_v31  ;;  %v4523_v31 = vld [vmem:[#allocation5 + $0x320] ss:$8 sps:$4 sm:$0xff]   ;;  %1859 = vmatpush1.bf16.msra.mxu1 %v4672_v30  ;;  %v4769_v30 = vld [vmem:[#allocation5 + $0xf4] ss:$8 sps:$4 sm:$0xff]  }
  0x64   :  { %1998 = vmatpush1.bf16.msra.mxu0 %v4438_v32  ;;  %v4529_v32 = vld [vmem:[#allocation3 + $0xd4] ss:$48 sps:$4 sm:$0xff]  }
  0x65   :  { %2080 = vmatprep.subr.bf16.mxu0 %v4444_v33  ;;  %v4528_v33 = vld [vmem:[#allocation5 + $0x334] ss:$8 sps:$4 sm:$0xff]  }
  0x67   :  { %2000 = vmatmul.mubr.bf16.vlgmr.msra.gmra.mrb[0].mxu0 %v4439_v34  ;;  %v4679_v34 = vld [vmem:[#allocation5 + $0x34] ss:$8 sps:$4 sm:$0xff]  }
  0x68   :  { %2081 = vmatpush1.bf16.msra.mxu0 %v4442_v35  ;;  %2009 = vmatprep.mubr.bf16.mxu0 %v4448_v36  ;;  %v4681_v35 = vld [vmem:[#allocation5 + $0x30] ss:$8 sps:$4 sm:$0xff]  }
  0x69   :  { %2082 = vmatprep.subr.bf16.mxu0 %v4447_v37  ;;  %v4526_v36 = vld [vmem:[#allocation5 + $0x330] ss:$8 sps:$4 sm:$0xff]   ;;  %v4534_v37 = vld [vmem:[#allocation5 + $0x344] ss:$8 sps:$4 sm:$0xff]   ;;  %1860 = vmatprep.subr.bf16.mxu1 %v4679_v34 }
  0x6a   :  { %1861 = vmatpush1.bf16.msra.mxu1 %v4681_v35  ;;  %v4774_v34 = vld [vmem:[#allocation3 + $0x4] ss:$48 sps:$4 sm:$0xff]   ;;  %v4583_v35 = vld [vmem:[#allocation3 + $0x18] ss:$48 sps:$4 sm:$0xff]  }
  0x6b   :  { %1886 = vmatprep.mubr.bf16.mxu1 %v4774_v34  ;;  %v4658_v34 = vld [vmem:[#allocation3 + $0x20] ss:$48 sps:$4 sm:$0xff]  }
  0x6c   :  { %2083 = vmatpush1.bf16.msra.mxu0 %v4445_v38  ;;  %v4531_v38 = vld [vmem:[#allocation3 + $0xd0] ss:$48 sps:$4 sm:$0xff]  }
  0x6d   :  { %2084 = vmatprep.subr.bf16.mxu0 %v4453_v39  ;;  %v4685_v39 = vld [vmem:[#allocation5 + $0x44] ss:$8 sps:$4 sm:$0xff]  }
  0x6e   :  { %1862 = vmatprep.subr.bf16.mxu1 %v4685_v39  ;;  %v4592_v39 = vld [vmem:[#allocation3 + $0x7c] ss:$48 sps:$4 sm:$0xff]  }
  0x6f   :  { %2010 = vmatmul.mubr.bf16.gmra.mrb[4].mxu0 %v4450_v40  ;;  %v4687_v40 = vld [vmem:[#allocation5 + $0x40] ss:$8 sps:$4 sm:$0xff]  }
  0x70   :  { %2085 = vmatpush1.bf16.msra.mxu0 %v4451_v41  ;;  %2019 = vmatprep.mubr.bf16.mxu0 %v4457_v42  ;;  %v4532_v41 = vld [vmem:[#allocation5 + $0x340] ss:$8 sps:$4 sm:$0xff]   ;;  %v4538_v42 = vld [vmem:[#allocation3 + $0x134] ss:$48 sps:$4 sm:$0xff]  }
  0x71   :  { %2086 = vmatprep.subr.bf16.mxu0 %v4456_v43  ;;  %v4537_v43 = vld [vmem:[#allocation5 + $0x354] ss:$8 sps:$4 sm:$0xff]   ;;  %1863 = vmatpush1.bf16.msra.mxu1 %v4687_v40  ;;  %v4589_v40 = vld [vmem:[#allocation5 + $0x410] ss:$8 sps:$4 sm:$0xff]  }
  0x74   :  { %2087 = vmatpush1.bf16.msra.mxu0 %v4454_v44  ;;  %v4694_v44 = vld [vmem:[#allocation5 + $0x54] ss:$8 sps:$4 sm:$0xff]  }
  0x75   :  { %2088 = vmatprep.subr.bf16.mxu0 %v4462_v45  ;;  %v4696_v45 = vld [vmem:[#allocation5 + $0x50] ss:$8 sps:$4 sm:$0xff]   ;;  %1864 = vmatprep.subr.bf16.mxu1 %v4694_v44 }
  0x76   :  { %1865 = vmatpush1.bf16.msra.mxu1 %v4696_v45  ;;  %v4594_v44 = vld [vmem:[#allocation3 + $0x78] ss:$48 sps:$4 sm:$0xff]  }
  0x77   :  { %2020 = vmatmul.mubr.bf16.gmra.mrb[8].mxu0 %v4459_v46  ;;  %v4535_v46 = vld [vmem:[#allocation5 + $0x350] ss:$8 sps:$4 sm:$0xff]   ;;  %v4595_v45 = vld [vmem:[#allocation5 + $0x420] ss:$8 sps:$4 sm:$0xff]  }
  0x78   :  { %2089 = vmatpush1.bf16.msra.mxu0 %v4460_v47  ;;  %2029 = vmatprep.mubr.bf16.mxu0 %v4466_v48  ;;  %v4543_v47 = vld [vmem:[#allocation5 + $0x364] ss:$8 sps:$4 sm:$0xff]   ;;  %v4540_v48 = vld [vmem:[#allocation3 + $0x130] ss:$48 sps:$4 sm:$0xff]  }
  0x79   :  { %2090 = vmatprep.subr.bf16.mxu0 %v4465_v49  ;;  %v4700_v49 = vld [vmem:[#allocation5 + $0x64] ss:$8 sps:$4 sm:$0xff]  }
  0x7a   :  { %1866 = vmatprep.subr.bf16.mxu1 %v4700_v49  ;;  %v4598_v49 = vld [vmem:[#allocation5 + $0x430] ss:$8 sps:$4 sm:$0xff]  }
  0x7c   :  { %2091 = vmatpush1.bf16.msra.mxu0 %v4463_v50  ;;  %v4702_v50 = vld [vmem:[#allocation5 + $0x60] ss:$8 sps:$4 sm:$0xff]  }
  0x7d   :  { %2092 = vmatprep.subr.bf16.mxu0 %v4471_v51  ;;  %v4541_v51 = vld [vmem:[#allocation5 + $0x360] ss:$8 sps:$4 sm:$0xff]   ;;  %1867 = vmatpush1.bf16.msra.mxu1 %v4702_v50  ;;  %v4606_v50 = vld [vmem:[#allocation5 + $0x444] ss:$8 sps:$4 sm:$0xff]  }
  0x7f   :  { %2030 = vmatmul.mubr.bf16.gmra.mrb[12].mxu0 %v4468_v52  ;;  %v4547_v52 = vld [vmem:[#allocation3 + $0x194] ss:$48 sps:$4 sm:$0xff]  }
  0x80   :  { %2093 = vmatpush1.bf16.msra.mxu0 %v4469_v53  ;;  %2039 = vmatprep.mubr.bf16.mxu0 %v4475_v54  ;;  %v4546_v53 = vld [vmem:[#allocation5 + $0x374] ss:$8 sps:$4 sm:$0xff]  }
  0x81   :  { %2094 = vmatprep.subr.bf16.mxu0 %v4474_v55  ;;  %v4709_v54 = vld [vmem:[#allocation5 + $0x74] ss:$8 sps:$4 sm:$0xff]   ;;  %v4711_v55 = vld [vmem:[#allocation5 + $0x70] ss:$8 sps:$4 sm:$0xff]  }
  0x82   :  { %1868 = vmatprep.subr.bf16.mxu1 %v4709_v54  ;;  %v4610_v54 = vld [vmem:[#allocation3 + $0x13c] ss:$48 sps:$4 sm:$0xff]  }
  0x83   :  { %1869 = vmatpush1.bf16.msra.mxu1 %v4711_v55  ;;  %v4609_v55 = vld [vmem:[#allocation5 + $0x454] ss:$8 sps:$4 sm:$0xff]  }
  0x84   :  { %2095 = vmatpush1.bf16.msra.mxu0 %v4472_v56  ;;  %v4544_v56 = vld [vmem:[#allocation5 + $0x370] ss:$8 sps:$4 sm:$0xff]  }
  0x85   :  { %2096 = vmatprep.subr.bf16.mxu0 %v4480_v57  ;;  %v4552_v57 = vld [vmem:[#allocation5 + $0x384] ss:$8 sps:$4 sm:$0xff]  }
  0x87   :  { %2040 = vmatmul.mubr.bf16.gmra.mrb[16].mxu0 %v4477_v58  ;;  %v4549_v58 = vld [vmem:[#allocation3 + $0x190] ss:$48 sps:$4 sm:$0xff]  }
  0x88   :  { %2097 = vmatpush1.bf16.msra.mxu0 %v4478_v59  ;;  %2049 = vmatprep.mubr.bf16.mxu0 %v4484_v60  ;;  %v4715_v59 = vld [vmem:[#allocation5 + $0x84] ss:$8 sps:$4 sm:$0xff]   ;;  %v4717_v60 = vld [vmem:[#allocation5 + $0x80] ss:$8 sps:$4 sm:$0xff]  }
  0x89   :  { %2098 = vmatprep.subr.bf16.mxu0 %v4483_v61  ;;  %1870 = vmatprep.subr.bf16.mxu1 %v4715_v59  ;;  %v4550_v61 = vld [vmem:[#allocation5 + $0x380] ss:$8 sps:$4 sm:$0xff]  }
  0x8a   :  { %1871 = vmatpush1.bf16.msra.mxu1 %v4717_v60  ;;  %v4795_v59 = vld [vmem:[#allocation3 + $0x120] ss:$48 sps:$4 sm:$0xff]   ;;  %v4612_v60 = vld [vmem:[#allocation3 + $0x138] ss:$48 sps:$4 sm:$0xff]  }
  0x8c   :  { %2099 = vmatpush1.bf16.msra.mxu0 %v4481_v62  ;;  %v4556_v62 = vld [vmem:[#allocation3 + $0x1f4] ss:$48 sps:$4 sm:$0xff]  }
  0x8d   :  { %2100 = vmatprep.subr.bf16.mxu0 %v4489_v63  ;;  %v4555_v63 = vld [vmem:[#allocation5 + $0x394] ss:$8 sps:$4 sm:$0xff]  }
  0x8f   :  { %2050 = vmatmul.mubr.bf16.gmra.mrb[20].mxu0 %v4486_v0  ;;  %v4724_v0 = vld [vmem:[#allocation5 + $0x94] ss:$8 sps:$4 sm:$0xff]  }
  0x90   :  { %2101 = vmatpush1.bf16.msra.mxu0 %v4487_v1  ;;  %2059 = vmatprep.mubr.bf16.mxu0 %v4493_v2  ;;  %v4726_v1 = vld [vmem:[#allocation5 + $0x90] ss:$8 sps:$4 sm:$0xff]  }
  0x91   :  { %2102 = vmatprep.subr.bf16.mxu0 %v4492_v3  ;;  %v4553_v2 = vld [vmem:[#allocation5 + $0x390] ss:$8 sps:$4 sm:$0xff]   ;;  %v4561_v3 = vld [vmem:[#allocation5 + $0x3a4] ss:$8 sps:$4 sm:$0xff]   ;;  %1872 = vmatprep.subr.bf16.mxu1 %v4724_v0 }
  0x92   :  { %1873 = vmatpush1.bf16.msra.mxu1 %v4726_v1  ;;  %v4799_v0 = vld [vmem:[#allocation3 + $0x184] ss:$48 sps:$4 sm:$0xff]   ;;  %v4616_v1 = vld [vmem:[#allocation5 + $0x470] ss:$8 sps:$4 sm:$0xff]  }
  0x94   :  { %2103 = vmatpush1.bf16.msra.mxu0 %v4490_v4  ;;  %v4558_v4 = vld [vmem:[#allocation3 + $0x1f0] ss:$48 sps:$4 sm:$0xff]  }
  0x95   :  { %2104 = vmatprep.subr.bf16.mxu0 %v4498_v5  ;;  %v4730_v5 = vld [vmem:[#allocation5 + $0xa4] ss:$8 sps:$4 sm:$0xff]  }
  0x96   :  { %1874 = vmatprep.subr.bf16.mxu1 %v4730_v5  ;;  %v4622_v5 = vld [vmem:[#allocation5 + $0x480] ss:$8 sps:$4 sm:$0xff]  }
  0x97   :  { %2060 = vmatmul.mubr.bf16.gmra.mrb[24].mxu0 %v4495_v6  ;;  %v4732_v6 = vld [vmem:[#allocation5 + $0xa0] ss:$8 sps:$4 sm:$0xff]  }
  0x98   :  { %2105 = vmatpush1.bf16.msra.mxu0 %v4496_v7  ;;  %2069 = vmatprep.mubr.bf16.mxu0 %v4502_v8  ;;  %v4559_v7 = vld [vmem:[#allocation5 + $0x3a0] ss:$8 sps:$4 sm:$0xff]   ;;  %v4565_v8 = vld [vmem:[#allocation3 + $0x254] ss:$48 sps:$4 sm:$0xff]  }
  0x99   :  { %2106 = vmatprep.subr.bf16.mxu0 %v4501_v9  ;;  %v4564_v9 = vld [vmem:[#allocation5 + $0x3b4] ss:$8 sps:$4 sm:$0xff]   ;;  %1875 = vmatpush1.bf16.msra.mxu1 %v4732_v6 }
  0x9a   :  { %v4628_v6 = vld [vmem:[#allocation3 + $0x1fc] ss:$48 sps:$4 sm:$0xff]  }
  0x9c   :  { %2107 = vmatpush1.bf16.msra.mxu0 %v4499_v10  ;;  %v4739_v10 = vld [vmem:[#allocation5 + $0xb4] ss:$8 sps:$4 sm:$0xff]  }
  0x9d   :  { %2108 = vmatprep.subr.bf16.mxu0 %v4507_v11  ;;  %v4741_v11 = vld [vmem:[#allocation5 + $0xb0] ss:$8 sps:$4 sm:$0xff]   ;;  %1876 = vmatprep.subr.bf16.mxu1 %v4739_v10  ;;  %v4633_v10 = vld [vmem:[#allocation5 + $0x4a4] ss:$8 sps:$4 sm:$0xff]  }
  0x9e   :  { %1877 = vmatpush1.bf16.msra.mxu1 %v4741_v11  ;;  %v4807_v11 = vld [vmem:[#allocation3 + $0x1e0] ss:$48 sps:$4 sm:$0xff]  }
  0x9f   :  { %2070 = vmatmul.mubr.bf16.gmra.mrb[28].mxu0 %v4504_v12  ;;  %v4562_v12 = vld [vmem:[#allocation5 + $0x3b0] ss:$8 sps:$4 sm:$0xff]  }
  0xa0   :  { %2109 = vmatpush1.bf16.msra.mxu0 %v4505_v13  ;;  %2112 = vmatprep.mubr.bf16.mxu0 %v4513_v14  ;;  %v4570_v13 = vld [vmem:[#allocation5 + $0x3c4] ss:$8 sps:$4 sm:$0xff]   ;;  %v4567_v14 = vld [vmem:[#allocation3 + $0x250] ss:$48 sps:$4 sm:$0xff]  }
  0xa1   :  { %2110 = vmatprep.subr.bf16.mxu0 %v4510_v15  ;;  %v4745_v15 = vld [vmem:[#allocation5 + $0xc4] ss:$8 sps:$4 sm:$0xff]  }
  0xa2   :  { %1878 = vmatprep.subr.bf16.mxu1 %v4745_v15  ;;  %v4636_v15 = vld [vmem:[#allocation5 + $0x4b4] ss:$8 sps:$4 sm:$0xff]  }
  0xa4   :  { %2111 = vmatpush1.bf16.msra.mxu0 %v4508_v16  ;;  %v4747_v16 = vld [vmem:[#allocation5 + $0xc0] ss:$8 sps:$4 sm:$0xff]  }
  0xa5   :  { %2193 = vmatprep.subr.bf16.mxu0 %v4516_v17  ;;  %v4568_v17 = vld [vmem:[#allocation5 + $0x3c0] ss:$8 sps:$4 sm:$0xff]   ;;  %1879 = vmatpush1.bf16.msra.mxu1 %v4747_v16  ;;  %v4811_v16 = vld [vmem:[#allocation3 + $0x244] ss:$48 sps:$4 sm:$0xff]  }
  0xa6   :  { %1880 = vmatprep.subr.bf16.mxu1 %v4754_v20  ;;  %v4639_v20 = vld [vmem:[#allocation3 + $0x258] ss:$48 sps:$4 sm:$0xff]  }
  0xa7   :  { %2113 = vmatmul.mubr.bf16.vlgmr.msra.gmra.mrb[0].mxu0 %v4511_v18  ;;  %v4574_v18 = vld [vmem:[#allocation3 + $0x2b4] ss:$48 sps:$4 sm:$0xff]  }
  0xa8   :  { %2194 = vmatpush1.bf16.msra.mxu0 %v4514_v21  ;;  %2122 = vmatprep.mubr.bf16.mxu0 %v4520_v22  ;;  %v4756_v21 = vld [vmem:[#allocation5 + $0xd0] ss:$8 sps:$4 sm:$0xff]  }
  0xa9   :  { %2195 = vmatprep.subr.bf16.mxu0 %v4519_v23  ;;  %v4571_v22 = vld [vmem:[#allocation5 + $0x3d0] ss:$8 sps:$4 sm:$0xff]   ;;  %v4579_v23 = vld [vmem:[#allocation5 + $0x3e4] ss:$8 sps:$4 sm:$0xff]   ;;  %1881 = vmatpush1.bf16.msra.mxu1 %v4756_v21  ;;  %v4640_v21 = vld [vmem:[#allocation5 + $0x4c0] ss:$8 sps:$4 sm:$0xff]  }
  0xaa   :  { %1882 = vmatprep.subr.bf16.mxu1 %v4760_v25  ;;  %v4643_v25 = vld [vmem:[#allocation5 + $0x4d0] ss:$8 sps:$4 sm:$0xff]  }
  0xac   :  { %2196 = vmatpush1.bf16.msra.mxu0 %v4517_v26  ;;  %v4762_v26 = vld [vmem:[#allocation5 + $0xe0] ss:$8 sps:$4 sm:$0xff]  }
  0xad   :  { %2197 = vmatprep.subr.bf16.mxu0 %v4525_v27  ;;  %v4577_v27 = vld [vmem:[#allocation5 + $0x3e0] ss:$8 sps:$4 sm:$0xff]   ;;  %1883 = vmatpush1.bf16.msra.mxu1 %v4762_v26  ;;  %v4651_v26 = vld [vmem:[#allocation5 + $0x4e4] ss:$8 sps:$4 sm:$0xff]  }
  0xae   :  { %1884 = vmatprep.subr.bf16.mxu1 %v4769_v30  ;;  %v4660_v30 = vld [vmem:[#allocation3 + $0x24] ss:$48 sps:$4 sm:$0xff]  }
  0xaf   :  { %2123 = vmatmul.mubr.bf16.gmra.mrb[4].mxu0 %v4522_v28  ;;  %v4585_v28 = vld [vmem:[#allocation3 + $0x1c] ss:$48 sps:$4 sm:$0xff]  }
  0xb0   :  { %2198 = vmatpush1.bf16.msra.mxu0 %v4523_v31  ;;  %2132 = vmatprep.mubr.bf16.mxu0 %v4529_v32  ;;  %v4771_v31 = vld [vmem:[#allocation5 + $0xf0] ss:$8 sps:$4 sm:$0xff]  }
  0xb1   :  { %2199 = vmatprep.subr.bf16.mxu0 %v4528_v33  ;;  %v4580_v32 = vld [vmem:[#allocation5 + $0x3f0] ss:$8 sps:$4 sm:$0xff]   ;;  %v4588_v33 = vld [vmem:[#allocation5 + $0x404] ss:$8 sps:$4 sm:$0xff]   ;;  %1885 = vmatpush1.bf16.msra.mxu1 %v4771_v31  ;;  %v4654_v31 = vld [vmem:[#allocation5 + $0x4f4] ss:$8 sps:$4 sm:$0xff]  }
  0xb4   :  { %2200 = vmatpush1.bf16.msra.mxu0 %v4526_v36  ;;  %v4772_v36 = vld [vmem:[#allocation3] ss:$48 sps:$4 sm:$0xff]  }
  0xb5   :  { %2201 = vmatprep.subr.bf16.mxu0 %v4534_v37  ;;  %v4586_v37 = vld [vmem:[#allocation5 + $0x400] ss:$8 sps:$4 sm:$0xff]   ;;  %1887 = vmatmul.mubr.bf16.vlgmr.msra.gmra.mrb[0].mxu1 %v4772_v36  ;;  %v4673_v36 = vld [vmem:[#allocation3 + $0x84] ss:$48 sps:$4 sm:$0xff]  }
  0xb7   :  { %2133 = vmatmul.mubr.bf16.gmra.mrb[8].mxu0 %v4531_v38  ;;  %v4591_v38 = vld [vmem:[#allocation5 + $0x414] ss:$8 sps:$4 sm:$0xff]  }
  0xb8   :  { %2202 = vmatpush1.bf16.msra.mxu0 %v4532_v41  ;;  %2142 = vmatprep.mubr.bf16.mxu0 %v4538_v42  ;;  %v4597_v41 = vld [vmem:[#allocation5 + $0x424] ss:$8 sps:$4 sm:$0xff]  }
  0xb9   :  { %2203 = vmatprep.subr.bf16.mxu0 %v4537_v43  ;;  %v4781_v42 = vld [vmem:[#allocation3 + $0x64] ss:$48 sps:$4 sm:$0xff]   ;;  %v4783_v43 = vld [vmem:[#allocation3 + $0x60] ss:$48 sps:$4 sm:$0xff]  }
  0xba   :  { %1896 = vmatprep.mubr.bf16.mxu1 %v4781_v42  ;;  %v4688_v42 = vld [vmem:[#allocation3 + $0xe4] ss:$48 sps:$4 sm:$0xff]  }
  0xbc   :  { %2204 = vmatpush1.bf16.msra.mxu0 %v4535_v46  ;;  %v4601_v46 = vld [vmem:[#allocation3 + $0xdc] ss:$48 sps:$4 sm:$0xff]  }
  0xbd   :  { %2205 = vmatprep.subr.bf16.mxu0 %v4543_v47  ;;  %v4600_v47 = vld [vmem:[#allocation5 + $0x434] ss:$8 sps:$4 sm:$0xff]   ;;  %1897 = vmatmul.mubr.bf16.gmra.mrb[4].mxu1 %v4783_v43 }
  0xbe   :  { %v4684_v43 = vld [vmem:[#allocation5 + $0x534] ss:$8 sps:$4 sm:$0xff]  }
  0xbf   :  { %2143 = vmatmul.mubr.bf16.gmra.mrb[12].mxu0 %v4540_v48  ;;  %v4787_v48 = vld [vmem:[#allocation3 + $0xc4] ss:$48 sps:$4 sm:$0xff]  }
  0xc0   :  { %2206 = vmatpush1.bf16.msra.mxu0 %v4541_v51  ;;  %2152 = vmatprep.mubr.bf16.mxu0 %v4547_v52  ;;  %v4789_v51 = vld [vmem:[#allocation3 + $0xc0] ss:$48 sps:$4 sm:$0xff]   ;;  %v4603_v52 = vld [vmem:[#allocation3 + $0xd8] ss:$48 sps:$4 sm:$0xff]  }
  0xc1   :  { %2207 = vmatprep.subr.bf16.mxu0 %v4546_v53  ;;  %1906 = vmatprep.mubr.bf16.mxu1 %v4787_v48  ;;  %v4604_v53 = vld [vmem:[#allocation5 + $0x440] ss:$8 sps:$4 sm:$0xff]   ;;  %v4703_v48 = vld [vmem:[#allocation3 + $0x144] ss:$48 sps:$4 sm:$0xff]  }
  0xc4   :  { %2208 = vmatpush1.bf16.msra.mxu0 %v4544_v56  ;;  %v4793_v56 = vld [vmem:[#allocation3 + $0x124] ss:$48 sps:$4 sm:$0xff]  }
  0xc5   :  { %2209 = vmatprep.subr.bf16.mxu0 %v4552_v57  ;;  %1907 = vmatmul.mubr.bf16.gmra.mrb[8].mxu1 %v4789_v51  ;;  %v4607_v57 = vld [vmem:[#allocation5 + $0x450] ss:$8 sps:$4 sm:$0xff]   ;;  %v4708_v51 = vld [vmem:[#allocation5 + $0x564] ss:$8 sps:$4 sm:$0xff]  }
  0xc6   :  { %1916 = vmatprep.mubr.bf16.mxu1 %v4793_v56  ;;  %v4712_v56 = vld [vmem:[#allocation5 + $0x570] ss:$8 sps:$4 sm:$0xff]  }
  0xc7   :  { %2153 = vmatmul.mubr.bf16.gmra.mrb[16].mxu0 %v4549_v58  ;;  %v4615_v58 = vld [vmem:[#allocation5 + $0x464] ss:$8 sps:$4 sm:$0xff]  }
  0xc8   :  { %2210 = vmatpush1.bf16.msra.mxu0 %v4550_v61  ;;  %2162 = vmatprep.mubr.bf16.mxu0 %v4556_v62  ;;  %v4613_v61 = vld [vmem:[#allocation5 + $0x460] ss:$8 sps:$4 sm:$0xff]   ;;  %v4619_v62 = vld [vmem:[#allocation3 + $0x19c] ss:$48 sps:$4 sm:$0xff]  }
  0xc9   :  { %2211 = vmatprep.subr.bf16.mxu0 %v4555_v63  ;;  %v4618_v63 = vld [vmem:[#allocation5 + $0x474] ss:$8 sps:$4 sm:$0xff]  }
  0xcc   :  { %2212 = vmatpush1.bf16.msra.mxu0 %v4553_v2  ;;  %v4624_v2 = vld [vmem:[#allocation5 + $0x484] ss:$8 sps:$4 sm:$0xff]  }
  0xcd   :  { %2213 = vmatprep.subr.bf16.mxu0 %v4561_v3  ;;  %1917 = vmatmul.mubr.bf16.gmra.mrb[12].mxu1 %v4795_v59  ;;  %v4801_v3 = vld [vmem:[#allocation3 + $0x180] ss:$48 sps:$4 sm:$0xff]  }
  0xce   :  { %1926 = vmatprep.mubr.bf16.mxu1 %v4799_v0  ;;  %v4721_v59 = vld [vmem:[#allocation5 + $0x580] ss:$8 sps:$4 sm:$0xff]  }
  0xcf   :  { %2163 = vmatmul.mubr.bf16.gmra.mrb[20].mxu0 %v4558_v4  ;;  %v4621_v4 = vld [vmem:[#allocation3 + $0x198] ss:$48 sps:$4 sm:$0xff]   ;;  %v4735_v0 = vld [vmem:[#allocation3 + $0x200] ss:$48 sps:$4 sm:$0xff]  }
  0xd0   :  { %2214 = vmatpush1.bf16.msra.mxu0 %v4559_v7  ;;  %2172 = vmatprep.mubr.bf16.mxu0 %v4565_v8  ;;  %v4627_v7 = vld [vmem:[#allocation5 + $0x494] ss:$8 sps:$4 sm:$0xff]  }
  0xd1   :  { %2215 = vmatprep.subr.bf16.mxu0 %v4564_v9  ;;  %v4805_v8 = vld [vmem:[#allocation3 + $0x1e4] ss:$48 sps:$4 sm:$0xff]   ;;  %v4625_v9 = vld [vmem:[#allocation5 + $0x490] ss:$8 sps:$4 sm:$0xff]  }
  0xd4   :  { %2216 = vmatpush1.bf16.msra.mxu0 %v4562_v12  ;;  %v4630_v12 = vld [vmem:[#allocation3 + $0x1f8] ss:$48 sps:$4 sm:$0xff]  }
  0xd5   :  { %2217 = vmatprep.subr.bf16.mxu0 %v4570_v13  ;;  %1927 = vmatmul.mubr.bf16.gmra.mrb[16].mxu1 %v4801_v3  ;;  %v4631_v13 = vld [vmem:[#allocation5 + $0x4a0] ss:$8 sps:$4 sm:$0xff]   ;;  %v4744_v3 = vld [vmem:[#allocation5 + $0x5b4] ss:$8 sps:$4 sm:$0xff]  }
  0xd6   :  { %1936 = vmatprep.mubr.bf16.mxu1 %v4805_v8  ;;  %v4763_v8 = vld [vmem:[#allocation3 + $0x2c4] ss:$48 sps:$4 sm:$0xff]  }
  0xd7   :  { %2173 = vmatmul.mubr.bf16.gmra.mrb[24].mxu0 %v4567_v14  ;;  %v4637_v14 = vld [vmem:[#allocation3 + $0x25c] ss:$48 sps:$4 sm:$0xff]  }
  0xd8   :  { %2218 = vmatpush1.bf16.msra.mxu0 %v4568_v17  ;;  %2182 = vmatprep.mubr.bf16.mxu0 %v4574_v18  ;;  %v4634_v17 = vld [vmem:[#allocation5 + $0x4b0] ss:$8 sps:$4 sm:$0xff]   ;;  %v4642_v18 = vld [vmem:[#allocation5 + $0x4c4] ss:$8 sps:$4 sm:$0xff]  }
  0xd9   :  { %2219 = vmatprep.subr.bf16.mxu0 %v4573_v19  ;;  %v4813_v19 = vld [vmem:[#allocation3 + $0x240] ss:$48 sps:$4 sm:$0xff]  }
  0xdc   :  { %2220 = vmatpush1.bf16.msra.mxu0 %v4571_v22  ;;  %v4646_v22 = vld [vmem:[#allocation3 + $0x2bc] ss:$48 sps:$4 sm:$0xff]  }
  0xdd   :  { %2221 = vmatprep.subr.bf16.mxu0 %v4579_v23  ;;  %1937 = vmatmul.mubr.bf16.gmra.mrb[20].mxu1 %v4807_v11  ;;  %v4645_v23 = vld [vmem:[#allocation5 + $0x4d4] ss:$8 sps:$4 sm:$0xff]   ;;  %v4768_v11 = vld [vmem:[#allocation5 + $0x5e4] ss:$8 sps:$4 sm:$0xff]  }
  0xde   :  { %1946 = vmatprep.mubr.bf16.mxu1 %v4811_v16  ;;  %v4775_v16 = vld [vmem:[#allocation5 + $0x5f0] ss:$8 sps:$4 sm:$0xff]  }
  0xdf   :  { %2183 = vmatmul.mubr.bf16.gmra.mrb[28].mxu0 %v4576_v24  ;;  %v4817_v24 = vld [vmem:[#allocation3 + $0x2a4] ss:$48 sps:$4 sm:$0xff]  }
  0xe0   :  { %2222 = vmatpush1.bf16.msra.mxu0 %v4577_v27  ;;  %2225 = vmatprep.mubr.bf16.mxu0 %v4585_v28  ;;  %v4819_v27 = vld [vmem:[#allocation3 + $0x2a0] ss:$48 sps:$4 sm:$0xff]   ;;  %v4648_v28 = vld [vmem:[#allocation3 + $0x2b8] ss:$48 sps:$4 sm:$0xff]  }
  0xe1   :  { %2223 = vmatprep.subr.bf16.mxu0 %v4582_v29  ;;  %v4649_v29 = vld [vmem:[#allocation5 + $0x4e0] ss:$8 sps:$4 sm:$0xff]  }
  0xe4   :  { %2224 = vmatpush1.bf16.msra.mxu0 %v4580_v32  ;;  %v4652_v32 = vld [vmem:[#allocation5 + $0x4f0] ss:$8 sps:$4 sm:$0xff]  }
  0xe5   :  { %2306 = vmatprep.subr.bf16.mxu0 %v4588_v33  ;;  %1947 = vmatmul.mubr.bf16.gmra.mrb[24].mxu1 %v4813_v19  ;;  %v4663_v33 = vld [vmem:[#allocation5 + $0x504] ss:$8 sps:$4 sm:$0xff]   ;;  %v4786_v19 = vld [vmem:[#allocation3 + $0x88] ss:$48 sps:$4 sm:$0xff]  }
  0xe6   :  { %1956 = vmatprep.mubr.bf16.mxu1 %v4817_v24  ;;  %v4802_v24 = vld [vmem:[#allocation3 + $0x1ac] ss:$48 sps:$4 sm:$0xff]  }
  0xe7   :  { %2226 = vmatmul.mubr.bf16.vlgmr.msra.gmra.mrb[0].mxu0 %v4583_v35  ;;  %v4661_v35 = vld [vmem:[#allocation5 + $0x500] ss:$8 sps:$4 sm:$0xff]  }
  0xe8   :  { %2307 = vmatpush1.bf16.msra.mxu0 %v4586_v37  ;;  %2235 = vmatprep.mubr.bf16.mxu0 %v4592_v39  ;;  %v4669_v37 = vld [vmem:[#allocation5 + $0x514] ss:$8 sps:$4 sm:$0xff]   ;;  %v4678_v39 = vld [vmem:[#allocation5 + $0x524] ss:$8 sps:$4 sm:$0xff]  }
  0xe9   :  { %2308 = vmatprep.subr.bf16.mxu0 %v4591_v38  ;;  %v4667_v38 = vld [vmem:[#allocation5 + $0x510] ss:$8 sps:$4 sm:$0xff]  }
  0xec   :  { %2309 = vmatpush1.bf16.msra.mxu0 %v4589_v40  ;;  %v4675_v40 = vld [vmem:[#allocation3 + $0x80] ss:$48 sps:$4 sm:$0xff]  }
  0xed   :  { %2310 = vmatprep.subr.bf16.mxu0 %v4597_v41  ;;  %1957 = vmatmul.mubr.bf16.gmra.mrb[28].mxu1 %v4819_v27  ;;  %v4676_v41 = vld [vmem:[#allocation5 + $0x520] ss:$8 sps:$4 sm:$0xff]  }
  0xee   :  { %v4810_v27 = vld [vmem:[#allocation3 + $0x208] ss:$48 sps:$4 sm:$0xff]  }
  0xef   :  { %2236 = vmatmul.mubr.bf16.gmra.mrb[4].mxu0 %v4594_v44  ;;  %v4682_v44 = vld [vmem:[#allocation5 + $0x530] ss:$8 sps:$4 sm:$0xff]  }
  0xf0   :  { %2311 = vmatpush1.bf16.msra.mxu0 %v4595_v45  ;;  %2245 = vmatprep.mubr.bf16.mxu0 %v4601_v46  ;;  %v4693_v45 = vld [vmem:[#allocation5 + $0x544] ss:$8 sps:$4 sm:$0xff]   ;;  %v4690_v46 = vld [vmem:[#allocation3 + $0xe0] ss:$48 sps:$4 sm:$0xff]  }
  0xf1   :  { %2312 = vmatprep.subr.bf16.mxu0 %v4600_v47  ;;  %v4691_v47 = vld [vmem:[#allocation5 + $0x540] ss:$8 sps:$4 sm:$0xff]  }
  0xf4   :  { %2313 = vmatpush1.bf16.msra.mxu0 %v4598_v49  ;;  %v4699_v49 = vld [vmem:[#allocation5 + $0x554] ss:$8 sps:$4 sm:$0xff]  }
  0xf5   :  { %2314 = vmatprep.subr.bf16.mxu0 %v4606_v50  ;;  %v4697_v50 = vld [vmem:[#allocation5 + $0x550] ss:$8 sps:$4 sm:$0xff]  }
  0xf7   :  { %2246 = vmatmul.mubr.bf16.gmra.mrb[8].mxu0 %v4603_v52  ;;  %v4705_v52 = vld [vmem:[#allocation3 + $0x140] ss:$48 sps:$4 sm:$0xff]  }
  0xf8   :  { %2315 = vmatpush1.bf16.msra.mxu0 %v4604_v53  ;;  %2255 = vmatprep.mubr.bf16.mxu0 %v4610_v54  ;;  %v4706_v53 = vld [vmem:[#allocation5 + $0x560] ss:$8 sps:$4 sm:$0xff]   ;;  %v4718_v54 = vld [vmem:[#allocation3 + $0x1a4] ss:$48 sps:$4 sm:$0xff]  }
  0xf9   :  { %2316 = vmatprep.subr.bf16.mxu0 %v4609_v55  ;;  %v4714_v55 = vld [vmem:[#allocation5 + $0x574] ss:$8 sps:$4 sm:$0xff]  }
  0xfc   :  { %2317 = vmatpush1.bf16.msra.mxu0 %v4607_v57  ;;  %v4723_v57 = vld [vmem:[#allocation5 + $0x584] ss:$8 sps:$4 sm:$0xff]  }
  0xfd   :  { %2318 = vmatprep.subr.bf16.mxu0 %v4615_v58  ;;  %v4720_v58 = vld [vmem:[#allocation3 + $0x1a0] ss:$48 sps:$4 sm:$0xff]  }
  0xff   :  { %2256 = vmatmul.mubr.bf16.gmra.mrb[12].mxu0 %v4612_v60  ;;  %v4733_v60 = vld [vmem:[#allocation3 + $0x204] ss:$48 sps:$4 sm:$0xff]  }
 0x100   :  { %2319 = vmatpush1.bf16.msra.mxu0 %v4613_v61  ;;  %2265 = vmatprep.mubr.bf16.mxu0 %v4619_v62  ;;  %v4729_v61 = vld [vmem:[#allocation5 + $0x594] ss:$8 sps:$4 sm:$0xff]   ;;  %v4727_v62 = vld [vmem:[#allocation5 + $0x590] ss:$8 sps:$4 sm:$0xff]  }
 0x101   :  { %2320 = vmatprep.subr.bf16.mxu0 %v4618_v63  ;;  %v4738_v63 = vld [vmem:[#allocation5 + $0x5a4] ss:$8 sps:$4 sm:$0xff]  }
 0x104   :  { %2321 = vmatpush1.bf16.msra.mxu0 %v4616_v1  ;;  %v4736_v1 = vld [vmem:[#allocation5 + $0x5a0] ss:$8 sps:$4 sm:$0xff]  }
 0x105   :  { %2322 = vmatprep.subr.bf16.mxu0 %v4624_v2  ;;  %v4748_v2 = vld [vmem:[#allocation3 + $0x264] ss:$48 sps:$4 sm:$0xff]  }
 0x107   :  { %2266 = vmatmul.mubr.bf16.gmra.mrb[16].mxu0 %v4621_v4  ;;  %v4742_v4 = vld [vmem:[#allocation5 + $0x5b0] ss:$8 sps:$4 sm:$0xff]  }
 0x108   :  { %2323 = vmatpush1.bf16.msra.mxu0 %v4622_v5  ;;  %2275 = vmatprep.mubr.bf16.mxu0 %v4628_v6  ;;  %v4753_v5 = vld [vmem:[#allocation5 + $0x5c4] ss:$8 sps:$4 sm:$0xff]   ;;  %v4750_v6 = vld [vmem:[#allocation3 + $0x260] ss:$48 sps:$4 sm:$0xff]  }
 0x109   :  { %2324 = vmatprep.subr.bf16.mxu0 %v4627_v7  ;;  %v4751_v7 = vld [vmem:[#allocation5 + $0x5c0] ss:$8 sps:$4 sm:$0xff]  }
 0x10c   :  { %2325 = vmatpush1.bf16.msra.mxu0 %v4625_v9  ;;  %v4759_v9 = vld [vmem:[#allocation5 + $0x5d4] ss:$8 sps:$4 sm:$0xff]  }
 0x10d   :  { %2326 = vmatprep.subr.bf16.mxu0 %v4633_v10  ;;  %v4757_v10 = vld [vmem:[#allocation5 + $0x5d0] ss:$8 sps:$4 sm:$0xff]  }
 0x10f   :  { %2276 = vmatmul.mubr.bf16.gmra.mrb[20].mxu0 %v4630_v12  ;;  %v4765_v12 = vld [vmem:[#allocation3 + $0x2c0] ss:$48 sps:$4 sm:$0xff]  }
 0x110   :  { %2327 = vmatpush1.bf16.msra.mxu0 %v4631_v13  ;;  %2285 = vmatprep.mubr.bf16.mxu0 %v4637_v14  ;;  %v4766_v13 = vld [vmem:[#allocation5 + $0x5e0] ss:$8 sps:$4 sm:$0xff]   ;;  %v4780_v14 = vld [vmem:[#allocation3 + $0x2c] ss:$48 sps:$4 sm:$0xff]  }
 0x111   :  { %2328 = vmatprep.subr.bf16.mxu0 %v4636_v15  ;;  %v4777_v15 = vld [vmem:[#allocation5 + $0x5f4] ss:$8 sps:$4 sm:$0xff]  }
 0x114   :  { %2329 = vmatpush1.bf16.msra.mxu0 %v4634_v17  ;;  %v4778_v17 = vld [vmem:[#allocation3 + $0x28] ss:$48 sps:$4 sm:$0xff]  }
 0x115   :  { %2330 = vmatprep.subr.bf16.mxu0 %v4642_v18  ;;  %v4784_v18 = vld [vmem:[#allocation3 + $0x8c] ss:$48 sps:$4 sm:$0xff]  }
 0x117   :  { %2286 = vmatmul.mubr.bf16.gmra.mrb[24].mxu0 %v4639_v20  ;;  %v4790_v20 = vld [vmem:[#allocation3 + $0xec] ss:$48 sps:$4 sm:$0xff]  }
 0x118   :  { %2331 = vmatpush1.bf16.msra.mxu0 %v4640_v21  ;;  %2295 = vmatprep.mubr.bf16.mxu0 %v4646_v22  ;;  %v4792_v21 = vld [vmem:[#allocation3 + $0xe8] ss:$48 sps:$4 sm:$0xff]   ;;  %v4796_v22 = vld [vmem:[#allocation3 + $0x14c] ss:$48 sps:$4 sm:$0xff]  }
 0x119   :  { %2332 = vmatprep.subr.bf16.mxu0 %v4645_v23  ;;  %v4798_v23 = vld [vmem:[#allocation3 + $0x148] ss:$48 sps:$4 sm:$0xff]  }
 0x11c   :  { %2333 = vmatpush1.bf16.msra.mxu0 %v4643_v25  ;;  %v4804_v25 = vld [vmem:[#allocation3 + $0x1a8] ss:$48 sps:$4 sm:$0xff]  }
 0x11d   :  { %2334 = vmatprep.subr.bf16.mxu0 %v4651_v26  ;;  %v4808_v26 = vld [vmem:[#allocation3 + $0x20c] ss:$48 sps:$4 sm:$0xff]  }
 0x11f   :  { %2296 = vmatmul.mubr.bf16.gmra.mrb[28].mxu0 %v4648_v28  ;;  %v4814_v28 = vld [vmem:[#allocation3 + $0x26c] ss:$48 sps:$4 sm:$0xff]  }
 0x120   :  { %2335 = vmatpush1.bf16.msra.mxu0 %v4649_v29  ;;  %2338 = vmatprep.mubr.bf16.mxu0 %v4660_v30  ;;  %v4816_v29 = vld [vmem:[#allocation3 + $0x268] ss:$48 sps:$4 sm:$0xff]   ;;  %v4820_v30 = vld [vmem:[#allocation3 + $0x2cc] ss:$48 sps:$4 sm:$0xff]  }
 0x121   :  { %2336 = vmatprep.subr.bf16.mxu0 %v4654_v31  ;;  %v4822_v31 = vld [vmem:[#allocation3 + $0x2c8] ss:$48 sps:$4 sm:$0xff]  }
 0x124   :  { %2337 = vmatpush1.bf16.msra.mxu0 %v4652_v32 }
 0x125   :  { %2419 = vmatprep.subr.bf16.mxu0 %v4663_v33 }
 0x127   :  { %2339 = vmatmul.mubr.bf16.vlgmr.msra.gmra.mrb[0].mxu0 %v4658_v34 }
 0x128   :  { %2420 = vmatpush1.bf16.msra.mxu0 %v4661_v35  ;;  %2348 = vmatprep.mubr.bf16.mxu0 %v4673_v36 }
 0x129   :  { %2421 = vmatprep.subr.bf16.mxu0 %v4669_v37 }
 0x12c   :  { %2422 = vmatpush1.bf16.msra.mxu0 %v4667_v38 }
 0x12d   :  { %2423 = vmatprep.subr.bf16.mxu0 %v4678_v39 }
 0x12f   :  { %2349 = vmatmul.mubr.bf16.gmra.mrb[4].mxu0 %v4675_v40 }
 0x130   :  { %2424 = vmatpush1.bf16.msra.mxu0 %v4676_v41  ;;  %2358 = vmatprep.mubr.bf16.mxu0 %v4688_v42 }
 0x131   :  { %2425 = vmatprep.subr.bf16.mxu0 %v4684_v43 }
 0x134   :  { %2426 = vmatpush1.bf16.msra.mxu0 %v4682_v44 }
 0x135   :  { %2427 = vmatprep.subr.bf16.mxu0 %v4693_v45 }
 0x137   :  { %2359 = vmatmul.mubr.bf16.gmra.mrb[8].mxu0 %v4690_v46 }
 0x138   :  { %2428 = vmatpush1.bf16.msra.mxu0 %v4691_v47  ;;  %2368 = vmatprep.mubr.bf16.mxu0 %v4703_v48 }
 0x139   :  { %2429 = vmatprep.subr.bf16.mxu0 %v4699_v49 }
 0x13c   :  { %2430 = vmatpush1.bf16.msra.mxu0 %v4697_v50 }
 0x13d   :  { %2431 = vmatprep.subr.bf16.mxu0 %v4708_v51 }
 0x13f   :  { %2369 = vmatmul.mubr.bf16.gmra.mrb[12].mxu0 %v4705_v52 }
 0x140   :  { %2432 = vmatpush1.bf16.msra.mxu0 %v4706_v53  ;;  %2378 = vmatprep.mubr.bf16.mxu0 %v4718_v54 }
 0x141   :  { %2433 = vmatprep.subr.bf16.mxu0 %v4714_v55 }
 0x144   :  { %2434 = vmatpush1.bf16.msra.mxu0 %v4712_v56 }
 0x145   :  { %2435 = vmatprep.subr.bf16.mxu0 %v4723_v57 }
 0x147   :  { %2379 = vmatmul.mubr.bf16.gmra.mrb[16].mxu0 %v4720_v58 }
 0x148   :  { %2436 = vmatpush1.bf16.msra.mxu0 %v4721_v59  ;;  %2388 = vmatprep.mubr.bf16.mxu0 %v4733_v60 }
 0x149   :  { %2437 = vmatprep.subr.bf16.mxu0 %v4729_v61 }
 0x14c   :  { %2438 = vmatpush1.bf16.msra.mxu0 %v4727_v62 }
 0x14d   :  { %2439 = vmatprep.subr.bf16.mxu0 %v4738_v63 }
 0x14f   :  { %2389 = vmatmul.mubr.bf16.gmra.mrb[20].mxu0 %v4735_v0  ;;  %v4967_v0 = vmov 0  }
 0x150   :  { %2440 = vmatpush1.bf16.msra.mxu0 %v4736_v1  ;;  %2398 = vmatprep.mubr.bf16.mxu0 %v4748_v2 }
 0x151   :  { %2441 = vmatprep.subr.bf16.mxu0 %v4744_v3  ;;  %2755 = vmatprep.mubr.bf16.mxu1 %v4967_v0 }
 0x154   :  { %2442 = vmatpush1.bf16.msra.mxu0 %v4742_v4 }
 0x155   :  { %2443 = vmatprep.subr.bf16.mxu0 %v4753_v5 }
 0x157   :  { %2399 = vmatmul.mubr.bf16.gmra.mrb[24].mxu0 %v4750_v6 }
 0x158   :  { %2444 = vmatpush1.bf16.msra.mxu0 %v4751_v7  ;;  %2408 = vmatprep.mubr.bf16.mxu0 %v4763_v8 }
 0x159   :  { %2445 = vmatprep.subr.bf16.mxu0 %v4759_v9 }
 0x15c   :  { %2446 = vmatpush1.bf16.msra.mxu0 %v4757_v10 }
 0x15d   :  { %2447 = vmatprep.subr.bf16.mxu0 %v4768_v11 }
 0x15f   :  { %2409 = vmatmul.mubr.bf16.gmra.mrb[28].mxu0 %v4765_v12 }
 0x160   :  { %2448 = vmatpush1.bf16.msra.mxu0 %v4766_v13  ;;  %2451 = vmatprep.mubr.bf16.mxu0 %v4780_v14 }
 0x161   :  { %2449 = vmatprep.subr.bf16.mxu0 %v4777_v15 }
 0x164   :  { %2450 = vmatpush1.bf16.msra.mxu0 %v4775_v16 }
 0x167   :  { %2452 = vmatmul.mubr.bf16.vlgmr.msra.gmra.mrb[0].mxu0 %v4778_v17 }
 0x168   :  { %2461 = vmatprep.mubr.bf16.mxu0 %v4784_v18 }
 0x16f   :  { %2462 = vmatmul.mubr.bf16.gmra.mrb[4].mxu0 %v4786_v19 }
 0x170   :  { %2471 = vmatprep.mubr.bf16.mxu0 %v4790_v20 }
 0x177   :  { %2472 = vmatmul.mubr.bf16.gmra.mrb[8].mxu0 %v4792_v21 }
 0x178   :  { %2481 = vmatprep.mubr.bf16.mxu0 %v4796_v22 }
 0x17f   :  { %2482 = vmatmul.mubr.bf16.gmra.mrb[12].mxu0 %v4798_v23 }
 0x180   :  { %2491 = vmatprep.mubr.bf16.mxu0 %v4802_v24 }
 0x187   :  { %2492 = vmatmul.mubr.bf16.gmra.mrb[16].mxu0 %v4804_v25 }
 0x188   :  { %2501 = vmatprep.mubr.bf16.mxu0 %v4808_v26  ;;  %v1888_v32 = vpop.f32.mrb[0].mxu1 }
 0x189   :  { %v1890_v33 = vpop.f32.mrb[1].mxu1 }
 0x18a   :  { %v1892_v34 = vpop.f32.mrb[2].mxu1 }
 0x18b   :  { %v1894_v35 = vpop.f32.mrb[3].mxu1 }
 0x18f   :  { %2502 = vmatmul.mubr.bf16.gmra.mrb[20].mxu0 %v4810_v27 }
 0x190   :  { %2511 = vmatprep.mubr.bf16.mxu0 %v4814_v28  ;;  %v1898_v36 = vpop.f32.mrb[4].mxu1 }
 0x191   :  { %v1900_v37 = vpop.f32.mrb[5].mxu1 }
 0x192   :  { %v1902_v38 = vpop.f32.mrb[6].mxu1 }
 0x193   :  { %v1904_v39 = vpop.f32.mrb[7].mxu1 }
 0x197   :  { %2512 = vmatmul.mubr.bf16.gmra.mrb[24].mxu0 %v4816_v29 }
 0x198   :  { %2521 = vmatprep.mubr.bf16.mxu0 %v4820_v30  ;;  %v1908_v40 = vpop.f32.mrb[8].mxu1 }
 0x199   :  { %v1910_v41 = vpop.f32.mrb[9].mxu1 }
 0x19a   :  { %v1912_v42 = vpop.f32.mrb[10].mxu1 }
 0x19b   :  { %v1914_v43 = vpop.f32.mrb[11].mxu1 }
 0x19f   :  { %2522 = vmatmul.mubr.bf16.gmra.mrb[28].mxu0 %v4822_v31 }
 0x1a0   :  { %v1918_v44 = vpop.f32.mrb[12].mxu1 }
 0x1a1   :  { %v1920_v45 = vpop.f32.mrb[13].mxu1 }
 0x1a2   :  { %v1922_v46 = vpop.f32.mrb[14].mxu1 }
 0x1a3   :  { %v1924_v47 = vpop.f32.mrb[15].mxu1 }
 0x1a8   :  { %v5037_v48 = vpop.f32.mrb[16].mxu1 }
 0x1a9   :  { %v5039_v49 = vpop.f32.mrb[17].mxu1 }
 0x1aa   :  { %v5041_v50 = vpop.f32.mrb[18].mxu1 }
 0x1ab   :  { %v5043_v51 = vpop.f32.mrb[19].mxu1 }
 0x1b0   :  { %v5045_v52 = vpop.f32.mrb[20].mxu1 }
 0x1b1   :  { %v5047_v53 = vpop.f32.mrb[21].mxu1 }
 0x1b2   :  { %v5049_v54 = vpop.f32.mrb[22].mxu1 }
 0x1b3   :  { %v5051_v55 = vpop.f32.mrb[23].mxu1 }
 0x1b8   :  { %v5053_v56 = vpop.f32.mrb[24].mxu1 }
 0x1b9   :  { %v5055_v57 = vpop.f32.mrb[25].mxu1 }
 0x1ba   :  { %v5057_v58 = vpop.f32.mrb[26].mxu1 }
 0x1bb   :  { %v5059_v59 = vpop.f32.mrb[27].mxu1 }
 0x1c0   :  { %v5061_v60 = vpop.f32.mrb[28].mxu1 }
 0x1c1   :  { %v5063_v61 = vpop.f32.mrb[29].mxu1 }
 0x1c2   :  { %v5065_v62 = vpop.f32.mrb[30].mxu1 }
 0x1c3   :  { %v5067_v63 = vpop.f32.mrb[31].mxu1 }
 0x23a   :  { %v2453_v1 = vpop.f32.mrb[0].mxu0 }
 0x23b   :  { %v4224_v2 = vadd.f32 %v2453_v1, %v1888_v32  ;;  %v2455_v3 = vpop.f32.mrb[1].mxu0 }
 0x23c   :  { %v4225_v4 = vadd.f32 %v2455_v3, %v1890_v33  ;;  %v2457_v5 = vpop.f32.mrb[2].mxu0 }
 0x23d   :  { %v4226_v6 = vadd.f32 %v2457_v5, %v1892_v34  ;;  %v2459_v7 = vpop.f32.mrb[3].mxu0 }
 0x23e   :  { %v4227_v8 = vadd.f32 %v2459_v7, %v1894_v35 }
 0x23f   :  { %v2647_v9 = vpack.c.bf16 %v4226_v6, %v4224_v2 }
 0x240   :  { %v2648_v10 = vpack.c.bf16 %v4227_v8, %v4225_v4 }
 0x242   :  { %v2463_v11 = vpop.f32.mrb[4].mxu0  ;;  %2723 = vmatprep.subr.bf16.mxu1 %v2648_v10 }
 0x243   :  { %v4228_v12 = vadd.f32 %v2463_v11, %v1898_v36  ;;  %v2465_v13 = vpop.f32.mrb[5].mxu0  ;;  %2724 = vmatpush1.bf16.msra.mxu1 %v2647_v9 }
 0x244   :  { %v4229_v14 = vadd.f32 %v2465_v13, %v1900_v37  ;;  %v2467_v15 = vpop.f32.mrb[6].mxu0 }
 0x245   :  { %v4230_v16 = vadd.f32 %v2467_v15, %v1902_v38  ;;  %v2469_v17 = vpop.f32.mrb[7].mxu0 }
 0x246   :  { %v4231_v18 = vadd.f32 %v2469_v17, %v1904_v39 }
 0x247   :  { %v2649_v19 = vpack.c.bf16 %v4230_v16, %v4228_v12 }
 0x248   :  { %v2650_v20 = vpack.c.bf16 %v4231_v18, %v4229_v14 }
 0x24a   :  { %v2473_v21 = vpop.f32.mrb[8].mxu0  ;;  %2725 = vmatprep.subr.bf16.mxu1 %v2650_v20 }
 0x24b   :  { %v4232_v22 = vadd.f32 %v2473_v21, %v1908_v40  ;;  %v2475_v23 = vpop.f32.mrb[9].mxu0  ;;  %2726 = vmatpush1.bf16.msra.mxu1 %v2649_v19 }
 0x24c   :  { %v4233_v24 = vadd.f32 %v2475_v23, %v1910_v41  ;;  %v2477_v25 = vpop.f32.mrb[10].mxu0  ;;  %v4835_v23 = vld [vmem:[%s5492_s4 + $0x50] sm:$0xff]  }
 0x24d   :  { %v4234_v26 = vadd.f32 %v2477_v25, %v1912_v42  ;;  %v2479_v27 = vpop.f32.mrb[11].mxu0  ;;  %v4836_v25 = vld [vmem:[%s5492_s4 + $0x10] sm:$0xff]  }
 0x24e   :  { %v4235_v28 = vadd.f32 %v2479_v27, %v1914_v43  ;;  %v4838_v27 = vld [vmem:[%s5492_s4 + $0x18] sm:$0xff]  }
 0x24f   :  { %v2651_v29 = vpack.c.bf16 %v4234_v26, %v4232_v22  ;;  %v4837_v26 = vld [vmem:[%s5492_s4 + $0x58] sm:$0xff]  }
 0x250   :  { %v2652_v30 = vpack.c.bf16 %v4235_v28, %v4233_v24  ;;  %v5111_v24 = vld [vmem:[%s5488_s0 + $0x8] sm:$0xff]   ;;  %v4839_v28 = vld [vmem:[%s5492_s4 + $0x60] sm:$0xff]  }
 0x252   :  { %v2483_v31 = vpop.f32.mrb[12].mxu0  ;;  %2727 = vmatprep.subr.bf16.mxu1 %v2652_v30  ;;  %v4840_v30 = vld [vmem:[%s5492_s4 + $0x20] sm:$0xff]  }
 0x253   :  { %v4236_v32 = vadd.f32 %v2483_v31, %v1918_v44  ;;  %v2485_v33 = vpop.f32.mrb[13].mxu0  ;;  %2728 = vmatpush1.bf16.msra.mxu1 %v2651_v29  ;;  %v5130_v29 = vld [vmem:[%s5488_s0 + $0x10] sm:$0xff]   ;;  %v4841_v31 = vld [vmem:[%s5492_s4 + $0x68] sm:$0xff]  }
 0x254   :  { %v4237_v34 = vadd.f32 %v2485_v33, %v1920_v45  ;;  %v2487_v35 = vpop.f32.mrb[14].mxu0  ;;  %v4843_v33 = vld [vmem:[%s5492_s4 + $0x70] sm:$0xff]  }
 0x255   :  { %v4238_v36 = vadd.f32 %v2487_v35, %v1922_v46  ;;  %v2489_v37 = vpop.f32.mrb[15].mxu0  ;;  %v5156_v35 = vld [vmem:[%s5488_s0 + $0x20] sm:$0xff]  }
 0x256   :  { %v4239_v38 = vadd.f32 %v2489_v37, %v1924_v47  ;;  %v5170_v37 = vld [vmem:[%s5488_s0 + $0x30] sm:$0xff]  }
 0x257   :  { %v2653_v39 = vpack.c.bf16 %v4238_v36, %v4236_v32  ;;  %v4842_v32 = vld [vmem:[%s5492_s4 + $0x28] sm:$0xff]  }
 0x258   :  { %v2654_v40 = vpack.c.bf16 %v4239_v38, %v4237_v34  ;;  %v5149_v34 = vld [vmem:[%s5488_s0 + $0x18] sm:$0xff]   ;;  %v5163_v36 = vld [vmem:[%s5488_s0 + $0x28] sm:$0xff]  }
 0x259   :  { %v5177_v38 = vld [vmem:[%s5488_s0 + $0x38] sm:$0xff]  }
 0x25a   :  { %v2493_v1 = vpop.f32.mrb[16].mxu0  ;;  %2729 = vmatprep.subr.bf16.mxu1 %v2654_v40  ;;  %v4845_v40 = vld [vmem:[%s5492_s4 + $0x78] sm:$0xff]  }
 0x25b   :  { %v4240_v41 = vadd.f32 %v2493_v1, %v5037_v48  ;;  %v2495_v42 = vpop.f32.mrb[17].mxu0  ;;  %2730 = vmatpush1.bf16.msra.mxu1 %v2653_v39  ;;  %v4844_v39 = vld [vmem:[%s5492_s4 + $0x30] sm:$0xff]   ;;  %v2665_v1 = vlaneseq }
 0x25c   :  { %v4241_v43 = vadd.f32 %v2495_v42, %v5039_v49  ;;  %v2497_v2 = vpop.f32.mrb[18].mxu0 }
 0x25d   :  { %v4242_v44 = vadd.f32 %v2497_v2, %v5041_v50  ;;  %v2499_v3 = vpop.f32.mrb[19].mxu0 }
 0x25e   :  { %v4243_v45 = vadd.f32 %v2499_v3, %v5043_v51 }
 0x25f   :  { %v2655_v4 = vpack.c.bf16 %v4242_v44, %v4240_v41  ;;  %v2666_v41 = vshrl.u32 %v2665_v1, 7 }
 0x260   :  { %v2656_v46 = vpack.c.bf16 %v4243_v45, %v4241_v43  ;;  %v2663_v43 = vld [vmem:[%s5491_s3] sm:$0x3] }
 0x261   :  { %v2667_v42 = vsub.s32 0, %v2666_v41  ;;  %v2671_v2 = vsub.s32 1, %v2666_v41 }
 0x262   :  { %v2503_v5 = vpop.f32.mrb[20].mxu0  ;;  %2731 = vmatprep.subr.bf16.mxu1 %v2656_v46 }
 0x263   :  { %v4244_v47 = vadd.f32 %v2503_v5, %v5045_v52  ;;  %v2505_v6 = vpop.f32.mrb[21].mxu0  ;;  %2732 = vmatpush1.bf16.msra.mxu1 %v2655_v4  ;;  %v5192_v44 = vrot.slane %v2663_v43, %v2667_v42  ;;  %v5194_v3 = vrot.slane %v2663_v43, %v2671_v2 }
 0x264   :  { %v4245_v48 = vadd.f32 %v2505_v6, %v5047_v53  ;;  %v2507_v7 = vpop.f32.mrb[22].mxu0 }
 0x265   :  { %v4246_v8 = vadd.f32 %v2507_v7, %v5049_v54  ;;  %v2509_v49 = vpop.f32.mrb[23].mxu0 }
 0x266   :  { %v4247_v9 = vadd.f32 %v2509_v49, %v5051_v55 }
 0x267   :  { %v2657_v50 = vpack.c.bf16 %v4246_v8, %v4244_v47 }
 0x268   :  { %v2658_v10 = vpack.c.bf16 %v4247_v9, %v4245_v48 }
 0x26a   :  { %v2513_v11 = vpop.f32.mrb[24].mxu0  ;;  %2733 = vmatprep.subr.bf16.mxu1 %v2658_v10 }
 0x26b   :  { %v4248_v51 = vadd.f32 %v2513_v11, %v5053_v56  ;;  %v2515_v12 = vpop.f32.mrb[25].mxu0  ;;  %2734 = vmatpush1.bf16.msra.mxu1 %v2657_v50 }
 0x26c   :  { %v4249_v52 = vadd.f32 %v2515_v12, %v5055_v57  ;;  %v2517_v13 = vpop.f32.mrb[26].mxu0 }
 0x26d   :  { %v4250_v14 = vadd.f32 %v2517_v13, %v5057_v58  ;;  %v2519_v53 = vpop.f32.mrb[27].mxu0 }
 0x26e   :  { %v4251_v15 = vadd.f32 %v2519_v53, %v5059_v59  ;;  %v4831_v59 = vld [vmem:[%s5492_s4 + $0x40] sm:$0xff]  }
 0x26f   :  { %v2659_v54 = vpack.c.bf16 %v4250_v14, %v4248_v51 }
 0x270   :  { %v2660_v16 = vpack.c.bf16 %v4251_v15, %v4249_v52 }
 0x272   :  { %v2523_v17 = vpop.f32.mrb[28].mxu0  ;;  %2735 = vmatprep.subr.bf16.mxu1 %v2660_v16 }
 0x273   :  { %v4252_v55 = vadd.f32 %v2523_v17, %v5061_v60  ;;  %v2525_v18 = vpop.f32.mrb[29].mxu0  ;;  %2736 = vmatpush1.bf16.msra.mxu1 %v2659_v54  ;;  %v5092_v60 = vld [vmem:[%s5488_s0] sm:$0xff]  }
 0x274   :  { %v4253_v56 = vadd.f32 %v2525_v18, %v5063_v61  ;;  %v2527_v19 = vpop.f32.mrb[30].mxu0  ;;  %v4832_v61 = vld [vmem:[%s5492_s4] sm:$0xff]  }
 0x275   :  { %v4254_v20 = vadd.f32 %v2527_v19, %v5065_v62  ;;  %v2529_v57 = vpop.f32.mrb[31].mxu0  ;;  %v4833_v62 = vld [vmem:[%s5492_s4 + $0x48] sm:$0xff]  }
 0x276   :  { %v4255_v21 = vadd.f32 %v2529_v57, %v5067_v63  ;;  %v4834_v63 = vld [vmem:[%s5492_s4 + $0x8] sm:$0xff]  }
 0x277   :  { %v2661_v58 = vpack.c.bf16 %v4254_v20, %v4252_v55 }
 0x278   :  { %v2662_v22 = vpack.c.bf16 %v4255_v21, %v4253_v56 }
 0x27a   :  { %2737 = vmatprep.subr.bf16.mxu1 %v2662_v22 }
 0x27b   :  { %2738 = vmatpush1.bf16.msra.mxu1 %v2661_v58 }
 0x27c   :  { %4034 = vmatprep.subr.bf16.mxu1 %v4831_v59 }
 0x27e   :  { %2756 = vmatmul.mubr.bf16.vlgmr.msra.gmra.mrb[32].mxu1 %v5092_v60 }
 0x27f   :  { %2765 = vmatprep.mubr.bf16.mxu1 %v4967_v0  ;;  %4035 = vmatpush3.bf16.msra.mxu1 %v4832_v61 }
 0x280   :  { %4036 = vmatprep.subr.bf16.mxu1 %v4833_v62 }
 0x283   :  { %4037 = vmatpush3.bf16.msra.mxu1 %v4834_v63 }
 0x284   :  { %4038 = vmatprep.subr.bf16.mxu1 %v4835_v23 }
 0x286   :  { %2766 = vmatmul.mubr.bf16.gmra.mrb[36].mxu1 %v5111_v24 }
 0x287   :  { %2775 = vmatprep.mubr.bf16.mxu1 %v4967_v0  ;;  %4039 = vmatpush3.bf16.msra.mxu1 %v4836_v25 }
 0x288   :  { %4040 = vmatprep.subr.bf16.mxu1 %v4837_v26 }
 0x28b   :  { %4041 = vmatpush3.bf16.msra.mxu1 %v4838_v27 }
 0x28c   :  { %4042 = vmatprep.subr.bf16.mxu1 %v4839_v28 }
 0x28e   :  { %2776 = vmatmul.mubr.bf16.gmra.mrb[40].mxu1 %v5130_v29 }
 0x28f   :  { %2785 = vmatprep.mubr.bf16.mxu1 %v4967_v0  ;;  %4043 = vmatpush3.bf16.msra.mxu1 %v4840_v30 }
 0x290   :  { %4044 = vmatprep.subr.bf16.mxu1 %v4841_v31 }
 0x293   :  { %4045 = vmatpush3.bf16.msra.mxu1 %v4842_v32 }
 0x294   :  { %4046 = vmatprep.subr.bf16.mxu1 %v4843_v33 }
 0x296   :  { %2786 = vmatmul.mubr.bf16.gmra.mrb[44].mxu1 %v5149_v34 }
 0x297   :  { %2795 = vmatprep.mubr.bf16.mxu1 %v4967_v0  ;;  %4047 = vmatpush3.bf16.msra.mxu1 %v4844_v39 }
 0x298   :  { %4048 = vmatprep.subr.bf16.mxu1 %v4845_v40 }
 0x29e   :  { %2796 = vmatmul.mubr.bf16.gmra.mrb[48].mxu1 %v5156_v35 }
 0x29f   :  { %2805 = vmatprep.mubr.bf16.mxu1 %v4967_v0 }
 0x2a6   :  { %2806 = vmatmul.mubr.bf16.gmra.mrb[52].mxu1 %v5163_v36 }
 0x2a7   :  { %2815 = vmatprep.mubr.bf16.mxu1 %v4967_v0 }
 0x2ae   :  { %2816 = vmatmul.mubr.bf16.gmra.mrb[56].mxu1 %v5170_v37 }
 0x2af   :  { %2825 = vmatprep.mubr.bf16.mxu1 %v4967_v0  ;;  %v4846_v0 = vld [vmem:[%s5492_s4 + $0x38] sm:$0xff]  }
 0x2b0   :  { %4049 = vmatpush3.bf16.msra.mxu1 %v4846_v0 }
 0x2b6   :  { %2826 = vmatmul.mubr.bf16.gmra.mrb[60].mxu1 %v5177_v38 }
 0x351   :  { %v2757_v45 = vpop.f32.mrb[32].mxu1 }
 0x352   :  { %v2758_v4 = vadd.f32 %v2757_v45, %v5192_v44  ;;  %v2759_v46 = vpop.f32.mrb[33].mxu1 }
 0x353   :  { %v2760_v5 = vadd.f32 %v2759_v46, %v5194_v3  ;;  %v2761_v47 = vpop.f32.mrb[34].mxu1 }
 0x354   :  { %v2762_v6 = vadd.f32 %v2761_v47, %v5192_v44  ;;  %v2763_v48 = vpop.f32.mrb[35].mxu1  ;;  %v2836_v8 = vmax.f32 %v2758_v4, 0.0 }
 0x355   :  { %v2764_v7 = vadd.f32 %v2763_v48, %v5194_v3  ;;  %v2837_v9 = vmax.f32 %v2760_v5, 0.0 }
 0x356   :  { %v2838_v49 = vmax.f32 %v2762_v6, 0.0 }
 0x357   :  { %v2839_v50 = vmax.f32 %v2764_v7, 0.0 }
 0x358   :  { %v2868_v10 = vpack.c.bf16 %v2838_v49, %v2836_v8 }
 0x359   :  { %v2869_v11 = vpack.c.bf16 %v2839_v50, %v2837_v9  ;;  %v2767_v51 = vpop.f32.mrb[36].mxu1 }
 0x35a   :  { %v2768_v12 = vadd.f32 %v2767_v51, %v5192_v44  ;;  %v2769_v52 = vpop.f32.mrb[37].mxu1 }
 0x35b   :  { %v2770_v13 = vadd.f32 %v2769_v52, %v5194_v3  ;;  %v2771_v14 = vpop.f32.mrb[38].mxu1  ;;  %3044 = vmatprep.mubr.bf16.mxu1 %v2869_v11 }
 0x35c   :  { %v2772_v53 = vadd.f32 %v2771_v14, %v5192_v44  ;;  %v2773_v15 = vpop.f32.mrb[39].mxu1  ;;  %3045 = vmatmul.mubr.bf16.vlgmr.msra.gmra.mrb[64].mxu1 %v2868_v10  ;;  %v2840_v16 = vmax.f32 %v2768_v12, 0.0 }
 0x35d   :  { %v2774_v54 = vadd.f32 %v2773_v15, %v5194_v3  ;;  %v2841_v55 = vmax.f32 %v2770_v13, 0.0 }
 0x35e   :  { %v2842_v17 = vmax.f32 %v2772_v53, 0.0 }
 0x35f   :  { %v2843_v18 = vmax.f32 %v2774_v54, 0.0 }
 0x360   :  { %v2870_v56 = vpack.c.bf16 %v2842_v17, %v2840_v16 }
 0x361   :  { %v2871_v19 = vpack.c.bf16 %v2843_v18, %v2841_v55  ;;  %v2777_v20 = vpop.f32.mrb[40].mxu1 }
 0x362   :  { %v2778_v57 = vadd.f32 %v2777_v20, %v5192_v44  ;;  %v2779_v21 = vpop.f32.mrb[41].mxu1 }
 0x363   :  { %v2780_v58 = vadd.f32 %v2779_v21, %v5194_v3  ;;  %v2781_v22 = vpop.f32.mrb[42].mxu1  ;;  %3052 = vmatprep.mubr.bf16.mxu1 %v2871_v19 }
 0x364   :  { %v2782_v59 = vadd.f32 %v2781_v22, %v5192_v44  ;;  %v2783_v61 = vpop.f32.mrb[43].mxu1  ;;  %3053 = vmatmul.mubr.bf16.gmra.mrb[68].mxu1 %v2870_v56  ;;  %v2844_v63 = vmax.f32 %v2778_v57, 0.0 }
 0x365   :  { %v2784_v62 = vadd.f32 %v2783_v61, %v5194_v3  ;;  %v2845_v25 = vmax.f32 %v2780_v58, 0.0 }
 0x366   :  { %v2846_v23 = vmax.f32 %v2782_v59, 0.0 }
 0x367   :  { %v2847_v26 = vmax.f32 %v2784_v62, 0.0 }
 0x368   :  { %v2872_v27 = vpack.c.bf16 %v2846_v23, %v2844_v63 }
 0x369   :  { %v2873_v28 = vpack.c.bf16 %v2847_v26, %v2845_v25  ;;  %v2787_v30 = vpop.f32.mrb[44].mxu1 }
 0x36a   :  { %v2788_v31 = vadd.f32 %v2787_v30, %v5192_v44  ;;  %v2789_v32 = vpop.f32.mrb[45].mxu1 }
 0x36b   :  { %v2790_v33 = vadd.f32 %v2789_v32, %v5194_v3  ;;  %v2791_v39 = vpop.f32.mrb[46].mxu1  ;;  %3060 = vmatprep.mubr.bf16.mxu1 %v2873_v28 }
 0x36c   :  { %v2792_v40 = vadd.f32 %v2791_v39, %v5192_v44  ;;  %v2793_v0 = vpop.f32.mrb[47].mxu1  ;;  %3061 = vmatmul.mubr.bf16.gmra.mrb[72].mxu1 %v2872_v27  ;;  %v2848_v41 = vmax.f32 %v2788_v31, 0.0 }
 0x36d   :  { %v2794_v1 = vadd.f32 %v2793_v0, %v5194_v3  ;;  %v2849_v43 = vmax.f32 %v2790_v33, 0.0 }
 0x36e   :  { %v2850_v42 = vmax.f32 %v2792_v40, 0.0 }
 0x36f   :  { %v2851_v2 = vmax.f32 %v2794_v1, 0.0 }
 0x370   :  { %v2874_v45 = vpack.c.bf16 %v2850_v42, %v2848_v41 }
 0x371   :  { %v2875_v4 = vpack.c.bf16 %v2851_v2, %v2849_v43  ;;  %v2797_v46 = vpop.f32.mrb[48].mxu1 }
 0x372   :  { %v2798_v5 = vadd.f32 %v2797_v46, %v5192_v44  ;;  %v2799_v47 = vpop.f32.mrb[49].mxu1 }
 0x373   :  { %v2800_v6 = vadd.f32 %v2799_v47, %v5194_v3  ;;  %v2801_v48 = vpop.f32.mrb[50].mxu1  ;;  %3068 = vmatprep.mubr.bf16.mxu1 %v2875_v4 }
 0x374   :  { %v2802_v7 = vadd.f32 %v2801_v48, %v5192_v44  ;;  %v2803_v8 = vpop.f32.mrb[51].mxu1  ;;  %3069 = vmatmul.mubr.bf16.gmra.mrb[76].mxu1 %v2874_v45  ;;  %v2852_v9 = vmax.f32 %v2798_v5, 0.0 }
 0x375   :  { %v2804_v49 = vadd.f32 %v2803_v8, %v5194_v3  ;;  %v2853_v10 = vmax.f32 %v2800_v6, 0.0 }
 0x376   :  { %v2854_v50 = vmax.f32 %v2802_v7, 0.0 }
 0x377   :  { %v2855_v11 = vmax.f32 %v2804_v49, 0.0 }
 0x378   :  { %v2876_v51 = vpack.c.bf16 %v2854_v50, %v2852_v9 }
 0x379   :  { %v2877_v12 = vpack.c.bf16 %v2855_v11, %v2853_v10  ;;  %v2807_v52 = vpop.f32.mrb[52].mxu1 }
 0x37a   :  { %v2808_v13 = vadd.f32 %v2807_v52, %v5192_v44  ;;  %v2809_v14 = vpop.f32.mrb[53].mxu1 }
 0x37b   :  { %v2810_v53 = vadd.f32 %v2809_v14, %v5194_v3  ;;  %v2811_v15 = vpop.f32.mrb[54].mxu1  ;;  %3076 = vmatprep.mubr.bf16.mxu1 %v2877_v12 }
 0x37c   :  { %v2812_v54 = vadd.f32 %v2811_v15, %v5192_v44  ;;  %v2813_v16 = vpop.f32.mrb[55].mxu1  ;;  %3077 = vmatmul.mubr.bf16.gmra.mrb[80].mxu1 %v2876_v51  ;;  %v2856_v55 = vmax.f32 %v2808_v13, 0.0 }
 0x37d   :  { %v2814_v17 = vadd.f32 %v2813_v16, %v5194_v3  ;;  %v2857_v56 = vmax.f32 %v2810_v53, 0.0 }
 0x37e   :  { %v2858_v18 = vmax.f32 %v2812_v54, 0.0 }
 0x37f   :  { %v2859_v19 = vmax.f32 %v2814_v17, 0.0 }
 0x380   :  { %v2878_v20 = vpack.c.bf16 %v2858_v18, %v2856_v55 }
 0x381   :  { %v2879_v57 = vpack.c.bf16 %v2859_v19, %v2857_v56  ;;  %v2817_v21 = vpop.f32.mrb[56].mxu1 }
 0x382   :  { %v2818_v58 = vadd.f32 %v2817_v21, %v5192_v44  ;;  %v2819_v22 = vpop.f32.mrb[57].mxu1 }
 0x383   :  { %v2820_v59 = vadd.f32 %v2819_v22, %v5194_v3  ;;  %v2821_v61 = vpop.f32.mrb[58].mxu1  ;;  %3084 = vmatprep.mubr.bf16.mxu1 %v2879_v57 }
 0x384   :  { %v2822_v62 = vadd.f32 %v2821_v61, %v5192_v44  ;;  %v2823_v63 = vpop.f32.mrb[59].mxu1  ;;  %3085 = vmatmul.mubr.bf16.gmra.mrb[84].mxu1 %v2878_v20  ;;  %v2860_v25 = vmax.f32 %v2818_v58, 0.0 }
 0x385   :  { %v2824_v23 = vadd.f32 %v2823_v63, %v5194_v3  ;;  %v2861_v27 = vmax.f32 %v2820_v59, 0.0 }
 0x386   :  { %v2862_v26 = vmax.f32 %v2822_v62, 0.0 }
 0x387   :  { %v2863_v28 = vmax.f32 %v2824_v23, 0.0 }
 0x388   :  { %v2880_v30 = vpack.c.bf16 %v2862_v26, %v2860_v25 }
 0x389   :  { %v2881_v31 = vpack.c.bf16 %v2863_v28, %v2861_v27  ;;  %v2827_v32 = vpop.f32.mrb[60].mxu1 }
 0x38a   :  { %v2828_v33 = vadd.f32 %v2827_v32, %v5192_v44  ;;  %v2829_v39 = vpop.f32.mrb[61].mxu1 }
 0x38b   :  { %v2830_v40 = vadd.f32 %v2829_v39, %v5194_v3  ;;  %v2831_v0 = vpop.f32.mrb[62].mxu1  ;;  %3092 = vmatprep.mubr.bf16.mxu1 %v2881_v31 }
 0x38c   :  { %v2832_v1 = vadd.f32 %v2831_v0, %v5192_v44  ;;  %v2833_v41 = vpop.f32.mrb[63].mxu1  ;;  %3093 = vmatmul.mubr.bf16.gmra.mrb[88].mxu1 %v2880_v30  ;;  %v2864_v43 = vmax.f32 %v2828_v33, 0.0 }
 0x38d   :  { %v2834_v42 = vadd.f32 %v2833_v41, %v5194_v3  ;;  %v2865_v45 = vmax.f32 %v2830_v40, 0.0 }
 0x38e   :  { %v2866_v2 = vmax.f32 %v2832_v1, 0.0 }
 0x38f   :  { %v2867_v4 = vmax.f32 %v2834_v42, 0.0 }
 0x390   :  { %v2882_v46 = vpack.c.bf16 %v2866_v2, %v2864_v43 }
 0x391   :  { %v2883_v5 = vpack.c.bf16 %v2867_v4, %v2865_v45 }
 0x393   :  { %3100 = vmatprep.mubr.bf16.mxu1 %v2883_v5 }
 0x394   :  { %3101 = vmatmul.mubr.bf16.gmra.mrb[92].mxu1 %v2882_v46 }
 0x395   :  { %4156 = vmatprep.mubr.bf16.mxu1 %v5092_v60 }
 0x42f   :  { %v4050_v47 = vpop.f32.mrb[64].mxu1 }
 0x430   :  { %v4051_v6 = vpop.f32.mrb[65].mxu1 }
 0x431   :  { %v4052_v48 = vadd.f32 %v4051_v6, %v4050_v47  ;;  %v4053_v7 = vpop.f32.mrb[66].mxu1  ;;  %v4847_v47 = vld [vmem:[%s5494_s6] sm:$0xff]   ;;  %v4848_v6 = vld [vmem:[%s5494_s6 + $0x8] sm:$0xff]  }
 0x432   :  { %v4054_v8 = vpop.f32.mrb[67].mxu1 }
 0x433   :  { %v4055_v44 = vadd.f32 %v4054_v8, %v4053_v7 }
 0x435   :  { %v3109_v49 = vpack.c.bf16 %v4055_v44, %v4052_v48  ;;  %v4022_v48 = vld [vmem:[%s5493_s5] ss:$0 sm:$0xff] }
 0x437   :  { %v4056_v9 = vpop.f32.mrb[68].mxu1  ;;  %4140 = vmatprep.subr.bf16.mxu1 %v3109_v49 }
 0x438   :  { %v4057_v3 = vpop.f32.mrb[69].mxu1  ;;  %4141 = vmatpush3.bf16.msra.mxu1 %v3109_v49 }
 0x439   :  { %v4058_v50 = vadd.f32 %v4057_v3, %v4056_v9  ;;  %v4059_v10 = vpop.f32.mrb[70].mxu1 }
 0x43a   :  { %v4060_v11 = vpop.f32.mrb[71].mxu1 }
 0x43b   :  { %v4061_v51 = vadd.f32 %v4060_v11, %v4059_v10 }
 0x43d   :  { %v3110_v12 = vpack.c.bf16 %v4061_v51, %v4058_v50 }
 0x43f   :  { %v4062_v52 = vpop.f32.mrb[72].mxu1  ;;  %4142 = vmatprep.subr.bf16.mxu1 %v3110_v12 }
 0x440   :  { %v4063_v13 = vpop.f32.mrb[73].mxu1  ;;  %4143 = vmatpush3.bf16.msra.mxu1 %v3110_v12 }
 0x441   :  { %v4064_v14 = vadd.f32 %v4063_v13, %v4062_v52  ;;  %v4065_v53 = vpop.f32.mrb[74].mxu1 }
 0x442   :  { %v4066_v15 = vpop.f32.mrb[75].mxu1 }
 0x443   :  { %v4067_v54 = vadd.f32 %v4066_v15, %v4065_v53 }
 0x445   :  { %v3111_v16 = vpack.c.bf16 %v4067_v54, %v4064_v14 }
 0x447   :  { %v4068_v17 = vpop.f32.mrb[76].mxu1  ;;  %4144 = vmatprep.subr.bf16.mxu1 %v3111_v16 }
 0x448   :  { %v4069_v55 = vpop.f32.mrb[77].mxu1  ;;  %4145 = vmatpush3.bf16.msra.mxu1 %v3111_v16 }
 0x449   :  { %v4070_v18 = vadd.f32 %v4069_v55, %v4068_v17  ;;  %v4071_v56 = vpop.f32.mrb[78].mxu1 }
 0x44a   :  { %v4072_v19 = vpop.f32.mrb[79].mxu1 }
 0x44b   :  { %v4073_v20 = vadd.f32 %v4072_v19, %v4071_v56 }
 0x44d   :  { %v3112_v57 = vpack.c.bf16 %v4073_v20, %v4070_v18 }
 0x44f   :  { %v4074_v21 = vpop.f32.mrb[80].mxu1  ;;  %4146 = vmatprep.subr.bf16.mxu1 %v3112_v57 }
 0x450   :  { %v4075_v58 = vpop.f32.mrb[81].mxu1  ;;  %4147 = vmatpush3.bf16.msra.mxu1 %v3112_v57 }
 0x451   :  { %v4076_v22 = vadd.f32 %v4075_v58, %v4074_v21  ;;  %v4077_v59 = vpop.f32.mrb[82].mxu1 }
 0x452   :  { %v4078_v61 = vpop.f32.mrb[83].mxu1 }
 0x453   :  { %v4079_v62 = vadd.f32 %v4078_v61, %v4077_v59 }
 0x455   :  { %v3113_v63 = vpack.c.bf16 %v4079_v62, %v4076_v22 }
 0x457   :  { %v4080_v23 = vpop.f32.mrb[84].mxu1  ;;  %4148 = vmatprep.subr.bf16.mxu1 %v3113_v63 }
 0x458   :  { %v4081_v25 = vpop.f32.mrb[85].mxu1  ;;  %4149 = vmatpush3.bf16.msra.mxu1 %v3113_v63 }
 0x459   :  { %v4082_v26 = vadd.f32 %v4081_v25, %v4080_v23  ;;  %v4083_v27 = vpop.f32.mrb[86].mxu1 }
 0x45a   :  { %v4084_v28 = vpop.f32.mrb[87].mxu1 }
 0x45b   :  { %v4085_v30 = vadd.f32 %v4084_v28, %v4083_v27 }
 0x45d   :  { %v3114_v31 = vpack.c.bf16 %v4085_v30, %v4082_v26 }
 0x45f   :  { %v4086_v32 = vpop.f32.mrb[88].mxu1  ;;  %4150 = vmatprep.subr.bf16.mxu1 %v3114_v31 }
 0x460   :  { %v4087_v33 = vpop.f32.mrb[89].mxu1  ;;  %4151 = vmatpush3.bf16.msra.mxu1 %v3114_v31 }
 0x461   :  { %v4088_v39 = vadd.f32 %v4087_v33, %v4086_v32  ;;  %v4089_v40 = vpop.f32.mrb[90].mxu1 }
 0x462   :  { %v4090_v0 = vpop.f32.mrb[91].mxu1 }
 0x463   :  { %v4091_v1 = vadd.f32 %v4090_v0, %v4089_v40 }
 0x465   :  { %v3115_v41 = vpack.c.bf16 %v4091_v1, %v4088_v39 }
 0x467   :  { %v4092_v42 = vpop.f32.mrb[92].mxu1  ;;  %4152 = vmatprep.subr.bf16.mxu1 %v3115_v41 }
 0x468   :  { %v4093_v43 = vpop.f32.mrb[93].mxu1  ;;  %4153 = vmatpush3.bf16.msra.mxu1 %v3115_v41 }
 0x469   :  { %v4094_v2 = vadd.f32 %v4093_v43, %v4092_v42  ;;  %v4095_v45 = vpop.f32.mrb[94].mxu1 }
 0x46a   :  { %v4096_v4 = vpop.f32.mrb[95].mxu1 }
 0x46b   :  { %v4097_v46 = vadd.f32 %v4096_v4, %v4095_v45 }
 0x46d   :  { %v3116_v5 = vpack.c.bf16 %v4097_v46, %v4094_v2 }
 0x46f   :  { %4154 = vmatprep.subr.bf16.mxu1 %v3116_v5 }
 0x470   :  { %4155 = vmatpush3.bf16.msra.mxu1 %v3116_v5 }
 0x471   :  { %4172 = vmatprep.subr.bf16.mxu1 %v4847_v47 }
 0x473   :  { %4157 = vmatmul.mubr.bf16.vlgmr.msra.gmra.mrb[96].mxu1 %v5111_v24 }
 0x474   :  { %4160 = vmatprep.mubr.bf16.mxu1 %v5130_v29  ;;  %4173 = vmatpush3.bf16.msra.mxu1 %v4847_v47 }
 0x475   :  { %4174 = vmatprep.subr.bf16.mxu1 %v4848_v6 }
 0x478   :  { %4175 = vmatpush3.bf16.msra.mxu1 %v4848_v6 }
 0x47b   :  { %4161 = vmatmul.mubr.bf16.gmra.mrb[100].mxu1 %v5149_v34 }
 0x47c   :  { %4164 = vmatprep.mubr.bf16.mxu1 %v5156_v35 }
 0x483   :  { %4165 = vmatmul.mubr.bf16.gmra.mrb[104].mxu1 %v5163_v36 }
 0x484   :  { %4168 = vmatprep.mubr.bf16.mxu1 %v5170_v37 }
 0x48b   :  { %4169 = vmatmul.mubr.bf16.gmra.mrb[108].mxu1 %v5177_v38 }
 0x546   :  { %v4158_v7 = vpop.f32.mrb[96].mxu1 }
 0x547   :  { %v3167_v8 = vadd.f32 %v4158_v7, %v4022_v48  ;;  %v3158_v44 = vpop.f32.mrb[97].mxu1 }
 0x548   :  { %v3159_v49 = vadd.f32 %v4022_v48, %v3158_v44  ;;  %v4159_v9 = vpop.f32.mrb[98].mxu1 }
 0x549   :  { %v3170_v3 = vadd.f32 %v4159_v9, %v4022_v48  ;;  %v3161_v50 = vpop.f32.mrb[99].mxu1  ;;  %v3223_v11 = vmax.f32 %v3167_v8, 0.0 }
 0x54a   :  { %v3162_v10 = vadd.f32 %v4022_v48, %v3161_v50  ;;  %v3221_v12 = vmax.f32 %v3159_v49, 0.0 }
 0x54b   :  { %v3224_v51 = vmax.f32 %v3170_v3, 0.0 }
 0x54c   :  { %v3222_v52 = vmax.f32 %v3162_v10, 0.0 }
 0x54d   :  { %v3238_v13 = vpack.c.bf16 %v3224_v51, %v3223_v11 }
 0x54e   :  { %v3237_v14 = vpack.c.bf16 %v3222_v52, %v3221_v12  ;;  %v4162_v53 = vpop.f32.mrb[100].mxu1 }
 0x54f   :  { %v3183_v15 = vadd.f32 %v4162_v53, %v4022_v48  ;;  %v3174_v54 = vpop.f32.mrb[101].mxu1 }
 0x550   :  { %v3175_v16 = vadd.f32 %v4022_v48, %v3174_v54  ;;  %v4163_v17 = vpop.f32.mrb[102].mxu1  ;;  %4176 = vmatprep.mubr.msk.bf16.mxu1 %vm3261_vm0, %v3237_v14 }
 0x551   :  { %v3186_v55 = vadd.f32 %v4163_v17, %v4022_v48  ;;  %v3177_v18 = vpop.f32.mrb[103].mxu1  ;;  %4177 = vmatmul.mubr.msk.bf16.vlgmr.msra.gmra.mrb[112].mxu1 %vm3261_vm0, %v3238_v13  ;;  %v3227_v19 = vmax.f32 %v3183_v15, 0.0 }
 0x552   :  { %v3178_v56 = vadd.f32 %v4022_v48, %v3177_v18  ;;  %v3225_v57 = vmax.f32 %v3175_v16, 0.0 }
 0x553   :  { %v3228_v20 = vmax.f32 %v3186_v55, 0.0 }
 0x554   :  { %v3226_v21 = vmax.f32 %v3178_v56, 0.0 }
 0x555   :  { %v3240_v58 = vpack.c.bf16 %v3228_v20, %v3227_v19  ;;  %v4033_v20 = vld [vmem:[%s5495_s7] ss:$0 sm:$0xff] }
 0x556   :  { %v3239_v22 = vpack.c.bf16 %v3226_v21, %v3225_v57  ;;  %v4166_v59 = vpop.f32.mrb[104].mxu1 }
 0x557   :  { %v3199_v61 = vadd.f32 %v4166_v59, %v4022_v48  ;;  %v3190_v62 = vpop.f32.mrb[105].mxu1 }
 0x558   :  { %v3191_v63 = vadd.f32 %v4022_v48, %v3190_v62  ;;  %v4167_v23 = vpop.f32.mrb[106].mxu1  ;;  %4180 = vmatprep.mubr.msk.bf16.mxu1 %vm3261_vm0, %v3239_v22 }
 0x559   :  { %v3202_v25 = vadd.f32 %v4167_v23, %v4022_v48  ;;  %v3193_v26 = vpop.f32.mrb[107].mxu1  ;;  %4181 = vmatmul.mubr.msk.bf16.gmra.mrb[116].mxu1 %vm3261_vm0, %v3240_v58  ;;  %v3231_v28 = vmax.f32 %v3199_v61, 0.0 }
 0x55a   :  { %v3194_v27 = vadd.f32 %v4022_v48, %v3193_v26  ;;  %v3229_v31 = vmax.f32 %v3191_v63, 0.0 }
 0x55b   :  { %v3232_v30 = vmax.f32 %v3202_v25, 0.0 }
 0x55c   :  { %v3230_v32 = vmax.f32 %v3194_v27, 0.0 }
 0x55d   :  { %v3242_v33 = vpack.c.bf16 %v3232_v30, %v3231_v28 }
 0x55e   :  { %v3241_v39 = vpack.c.bf16 %v3230_v32, %v3229_v31  ;;  %v4170_v40 = vpop.f32.mrb[108].mxu1 }
 0x55f   :  { %v3215_v0 = vadd.f32 %v4170_v40, %v4022_v48  ;;  %v3206_v1 = vpop.f32.mrb[109].mxu1 }
 0x560   :  { %v3207_v41 = vadd.f32 %v4022_v48, %v3206_v1  ;;  %v4171_v42 = vpop.f32.mrb[110].mxu1  ;;  %4184 = vmatprep.mubr.msk.bf16.mxu1 %vm3261_vm0, %v3241_v39 }
 0x561   :  { %v3218_v43 = vadd.f32 %v4171_v42, %v4022_v48  ;;  %v3209_v2 = vpop.f32.mrb[111].mxu1  ;;  %4185 = vmatmul.mubr.msk.bf16.gmra.mrb[120].mxu1 %vm3261_vm0, %v3242_v33  ;;  %v3235_v4 = vmax.f32 %v3215_v0, 0.0 }
 0x562   :  { %v3210_v45 = vadd.f32 %v4022_v48, %v3209_v2  ;;  %v3233_v5 = vmax.f32 %v3207_v41, 0.0 }
 0x563   :  { %v3236_v46 = vmax.f32 %v3218_v43, 0.0 }
 0x564   :  { %v3234_v47 = vmax.f32 %v3210_v45, 0.0 }
 0x565   :  { %v3244_v6 = vpack.c.bf16 %v3236_v46, %v3235_v4 }
 0x566   :  { %v3243_v7 = vpack.c.bf16 %v3234_v47, %v3233_v5 }
 0x568   :  { %4188 = vmatprep.mubr.msk.bf16.mxu1 %vm3261_vm0, %v3243_v7 }
 0x569   :  { %4189 = vmatmul.mubr.msk.bf16.gmra.mrb[124].mxu1 %vm3261_vm0, %v3244_v6 }
 0x56a   :  { %4208 = vmatprep.mubr.bf16.mxu1 %v5092_v60 }
 0x624   :  { %v4178_v8 = vpop.f32.mrb[112].mxu1 }
 0x625   :  { %v3320_v44 = vpop.f32.mrb[113].mxu1 }
 0x626   :  { %v4179_v49 = vpop.f32.mrb[114].mxu1 }
 0x627   :  { %v3384_v9 = vpack.c.bf16 %v4179_v49, %v4178_v8  ;;  %v3323_v3 = vpop.f32.mrb[115].mxu1 }
 0x628   :  { %v3383_v50 = vpack.c.bf16 %v3323_v3, %v3320_v44 }
 0x62a   :  { %4192 = vmatprep.subr.bf16.mxu1 %v3383_v50 }
 0x62b   :  { %4193 = vmatpush3.bf16.msra.mxu1 %v3383_v50 }
 0x62c   :  { %v4182_v48 = vpop.f32.mrb[116].mxu1  ;;  %4194 = vmatprep.subr.bf16.mxu1 %v3384_v9 }
 0x62d   :  { %v3336_v10 = vpop.f32.mrb[117].mxu1 }
 0x62e   :  { %v4183_v11 = vpop.f32.mrb[118].mxu1 }
 0x62f   :  { %v3386_v51 = vpack.c.bf16 %v4183_v11, %v4182_v48  ;;  %v3339_v12 = vpop.f32.mrb[119].mxu1  ;;  %4195 = vmatpush3.bf16.msra.mxu1 %v3384_v9 }
 0x630   :  { %v3385_v52 = vpack.c.bf16 %v3339_v12, %v3336_v10 }
 0x632   :  { %4196 = vmatprep.subr.bf16.mxu1 %v3385_v52 }
 0x633   :  { %4197 = vmatpush3.bf16.msra.mxu1 %v3385_v52 }
 0x634   :  { %v4186_v13 = vpop.f32.mrb[120].mxu1  ;;  %4198 = vmatprep.subr.bf16.mxu1 %v3386_v51 }
 0x635   :  { %v3352_v60 = vpop.f32.mrb[121].mxu1 }
 0x636   :  { %v4187_v14 = vpop.f32.mrb[122].mxu1 }
 0x637   :  { %v3388_v53 = vpack.c.bf16 %v4187_v14, %v4186_v13  ;;  %v3355_v15 = vpop.f32.mrb[123].mxu1  ;;  %4199 = vmatpush3.bf16.msra.mxu1 %v3386_v51 }
 0x638   :  { %v3387_v54 = vpack.c.bf16 %v3355_v15, %v3352_v60 }
 0x63a   :  { %4200 = vmatprep.subr.bf16.mxu1 %v3387_v54 }
 0x63b   :  { %4201 = vmatpush3.bf16.msra.mxu1 %v3387_v54 }
 0x63c   :  { %v4190_v16 = vpop.f32.mrb[124].mxu1  ;;  %4202 = vmatprep.subr.bf16.mxu1 %v3388_v53 }
 0x63d   :  { %v3368_v17 = vpop.f32.mrb[125].mxu1 }
 0x63e   :  { %v4191_v55 = vpop.f32.mrb[126].mxu1 }
 0x63f   :  { %v3390_v18 = vpack.c.bf16 %v4191_v55, %v4190_v16  ;;  %v3371_v56 = vpop.f32.mrb[127].mxu1  ;;  %4203 = vmatpush3.bf16.msra.mxu1 %v3388_v53 }
 0x640   :  { %v3389_v19 = vpack.c.bf16 %v3371_v56, %v3368_v17 }
 0x642   :  { %4204 = vmatprep.subr.bf16.mxu1 %v3389_v19 }
 0x643   :  { %4205 = vmatpush3.bf16.msra.mxu1 %v3389_v19 }
 0x644   :  { %4206 = vmatprep.subr.bf16.mxu1 %v3390_v18 }
 0x647   :  { %4207 = vmatpush3.bf16.msra.mxu1 %v3390_v18 }
 0x64a   :  { %4209 = vmatmul.mubr.bf16.vlgmr.msra.gmra.mrb[128].mxu1 %v5111_v24 }
 0x64b   :  { %4212 = vmatprep.mubr.bf16.mxu1 %v5130_v29 }
 0x652   :  { %4213 = vmatmul.mubr.bf16.gmra.mrb[132].mxu1 %v5149_v34 }
 0x653   :  { %4216 = vmatprep.mubr.bf16.mxu1 %v5156_v35 }
 0x65a   :  { %4217 = vmatmul.mubr.bf16.gmra.mrb[136].mxu1 %v5163_v36 }
 0x65b   :  { %4220 = vmatprep.mubr.bf16.mxu1 %v5170_v37 }
 0x662   :  { %4221 = vmatmul.mubr.bf16.gmra.mrb[140].mxu1 %v5177_v38 }
 0x71d   :  { %v4210_v57 = vpop.f32.mrb[128].mxu1 }
 0x71e   :  { %v5264_v21 = vadd.f32 %v4210_v57, %v4033_v20  ;;  %v3432_v24 = vpop.f32.mrb[129].mxu1 }
 0x71f   :  { %v5266_v29 = vadd.f32 %v4033_v20, %v3432_v24  ;;  %v4211_v34 = vpop.f32.mrb[130].mxu1 }
 0x720   :  { %v3502_v35 = vsel %vm3495_vm1, %v5264_v21, -inf  ;;  %v5270_v36 = vadd.f32 %v4211_v34, %v4033_v20  ;;  %v3435_v37 = vpop.f32.mrb[131].mxu1 }
 0x721   :  { %3503 = vmax.xlane.f32.xlu1 %v3502_v35  ;;  %v5272_v38 = vadd.f32 %v4033_v20, %v3435_v37  ;;  %v3496_v58 = vsel %vm3495_vm1, %v5266_v29, -inf }
 0x722   :  { %3497 = vmax.xlane.f32.xlu0 %v3496_v58  ;;  %v3505_v22 = vsel %vm3495_vm1, %v5270_v36, -inf }
 0x723   :  { %v3499_v61 = vsel %vm3495_vm1, %v5272_v38, -inf }
 0x725   :  { %3506 = vmax.xlane.f32.xlu1 %v3505_v22  ;;  %v4214_v59 = vpop.f32.mrb[132].mxu1 }
 0x726   :  { %v5280_v62 = vadd.f32 %v4214_v59, %v4033_v20  ;;  %v3448_v63 = vpop.f32.mrb[133].mxu1  ;;  %3500 = vmax.xlane.f32.xlu0 %v3499_v61 }
 0x727   :  { %v4215_v23 = vpop.f32.mrb[134].mxu1  ;;  %v5286_v28 = vadd.f32 %v4033_v20, %v3448_v63 }
 0x728   :  { %v5282_v25 = vadd.f32 %v4215_v23, %v4033_v20  ;;  %v3514_v26 = vsel %vm3495_vm1, %v5280_v62, -inf  ;;  %v3451_v27 = vpop.f32.mrb[135].mxu1 }
 0x729   :  { %v5290_v31 = vadd.f32 %v4033_v20, %v3451_v27  ;;  %v3508_v33 = vsel %vm3495_vm1, %v5286_v28, -inf }
 0x72a   :  { %3515 = vmax.xlane.f32.xlu0 %v3514_v26  ;;  %v3517_v30 = vsel %vm3495_vm1, %v5282_v25, -inf }
 0x72b   :  { %3518 = vmax.xlane.f32.xlu1 %v3517_v30  ;;  %v3511_v0 = vsel %vm3495_vm1, %v5290_v31, -inf }
 0x72d   :  { %v4218_v32 = vpop.f32.mrb[136].mxu1 }
 0x72e   :  { %v5294_v39 = vadd.f32 %v4218_v32, %v4033_v20  ;;  %v3464_v40 = vpop.f32.mrb[137].mxu1  ;;  %3509 = vmax.xlane.f32.xlu0 %v3508_v33 }
 0x72f   :  { %v4219_v1 = vpop.f32.mrb[138].mxu1  ;;  %3512 = vmax.xlane.f32.xlu1 %v3511_v0  ;;  %v5302_v2 = vadd.f32 %v4033_v20, %v3464_v40 }
 0x730   :  { %v5298_v41 = vadd.f32 %v4219_v1, %v4033_v20  ;;  %v3526_v42 = vsel %vm3495_vm1, %v5294_v39, -inf  ;;  %v3467_v43 = vpop.f32.mrb[139].mxu1 }
 0x731   :  { %v5304_v45 = vadd.f32 %v4033_v20, %v3467_v43  ;;  %v3520_v5 = vsel %vm3495_vm1, %v5302_v2, -inf }
 0x732   :  { %3527 = vmax.xlane.f32.xlu0 %v3526_v42  ;;  %v3529_v4 = vsel %vm3495_vm1, %v5298_v41, -inf }
 0x733   :  { %3530 = vmax.xlane.f32.xlu1 %v3529_v4  ;;  %v3523_v6 = vsel %vm3495_vm1, %v5304_v45, -inf }
 0x735   :  { %v4222_v46 = vpop.f32.mrb[140].mxu1 }
 0x736   :  { %v3480_v47 = vpop.f32.mrb[141].mxu1  ;;  %3521 = vmax.xlane.f32.xlu0 %v3520_v5  ;;  %v5314_v49 = vadd.f32 %v4222_v46, %v4033_v20 }
 0x737   :  { %v5312_v7 = vadd.f32 %v4033_v20, %v3480_v47  ;;  %v4223_v8 = vpop.f32.mrb[142].mxu1  ;;  %3524 = vmax.xlane.f32.xlu1 %v3523_v6 }
 0x738   :  { %v3483_v44 = vpop.f32.mrb[143].mxu1  ;;  %v5320_v50 = vadd.f32 %v4223_v8, %v4033_v20  ;;  %v3538_v10 = vsel %vm3495_vm1, %v5314_v49, -inf }
 0x739   :  { %v5316_v9 = vadd.f32 %v4033_v20, %v3483_v44  ;;  %v3532_v3 = vsel %vm3495_vm1, %v5312_v7, -inf }
 0x73a   :  { %3533 = vmax.xlane.f32.xlu0 %v3532_v3  ;;  %v3541_v11 = vsel %vm3495_vm1, %v5320_v50, -inf }
 0x73b   :  { %v3535_v48 = vsel %vm3495_vm1, %v5316_v9, -inf }
 0x73c   :  { %3536 = vmax.xlane.f32.xlu1 %v3535_v48 }
 0x73e   :  { %3539 = vmax.xlane.f32.xlu0 %v3538_v10 }
 0x740   :  { %3542 = vmax.xlane.f32.xlu1 %v3541_v11 }
 0x7ae   :  { %v3504_v51 = vpop.xlane.xlu1 %3503 }
 0x7af   :  { %v5329_v12 = vsub.f32 %v5264_v21, %v3504_v51  ;;  %v3498_v52 = vpop.xlane.xlu0 %3497 }
 0x7b0   :  { %v5332_v13 = vsub.f32 %v5266_v29, %v3498_v52 }
 0x7b1   :  { %v3564_v60 = vmul.f32 1.442695, %v5329_v12 }
 0x7b2   :  { %v3560_v14 = vmul.f32 1.442695, %v5332_v13  ;;  %v3507_v53 = vpop.xlane.xlu1 %3506 }
 0x7b3   :  { %4849 = vpow2.f32 %v3564_v60  ;;  %v5337_v15 = vsub.f32 %v5270_v36, %v3507_v53  ;;  %v3501_v54 = vpop.xlane.xlu0 %3500 }
 0x7b4   :  { %v5340_v16 = vsub.f32 %v5272_v38, %v3501_v54  ;;  %4851 = vpow2.f32 %v3560_v14 }
 0x7b5   :  { %v3566_v17 = vmul.f32 1.442695, %v5337_v15 }
 0x7b6   :  { %v3562_v55 = vmul.f32 1.442695, %v5340_v16 }
 0x7b7   :  { %4853 = vpow2.f32 %v3566_v17  ;;  %v3516_v18 = vpop.xlane.xlu0 %3515 }
 0x7b8   :  { %v5345_v56 = vsub.f32 %v5280_v62, %v3516_v18  ;;  %v3519_v19 = vpop.xlane.xlu1 %3518  ;;  %4855 = vpow2.f32 %v3562_v55 }
 0x7b9   :  { %v5348_v20 = vsub.f32 %v5282_v25, %v3519_v19 }
 0x7ba   :  { %v3572_v57 = vmul.f32 1.442695, %v5345_v56 }
 0x7bb   :  { %v3574_v21 = vmul.f32 1.442695, %v5348_v20  ;;  %v3510_v24 = vpop.xlane.xlu0 %3509 }
 0x7bc   :  { %4857 = vpow2.f32 %v3572_v57  ;;  %v5353_v29 = vsub.f32 %v5286_v28, %v3510_v24  ;;  %v3513_v34 = vpop.xlane.xlu1 %3512 }
 0x7bd   :  { %v4850_v35 = vpop.eup %4849  ;;  %4859 = vpow2.f32 %v3574_v21  ;;  %v5356_v36 = vsub.f32 %v5290_v31, %v3513_v34 }
 0x7be   :  { %v3568_v37 = vmul.f32 1.442695, %v5353_v29  ;;  %v3598_v38 = vsel %vm3495_vm1, %v4850_v35, 0.0  ;;  %v4852_v58 = vpop.eup %4851 }
 0x7bf   :  { %v3570_v22 = vmul.f32 1.442695, %v5356_v36  ;;  %3599 = vadd.xlane.f32.xlu0 %v3598_v38  ;;  %v3528_v59 = vpop.xlane.xlu0 %3527  ;;  %v3592_v27 = vsel %vm3495_vm1, %v4852_v58, 0.0 }
 0x7c0   :  { %4861 = vpow2.f32 %v3568_v37  ;;  %v5362_v61 = vsub.f32 %v5294_v39, %v3528_v59  ;;  %v3531_v62 = vpop.xlane.xlu1 %3530 }
 0x7c1   :  { %v4854_v63 = vpop.eup %4853  ;;  %4863 = vpow2.f32 %v3570_v22  ;;  %v5365_v23 = vsub.f32 %v5298_v41, %v3531_v62 }
 0x7c2   :  { %v3580_v25 = vmul.f32 1.442695, %v5362_v61  ;;  %v3601_v26 = vsel %vm3495_vm1, %v4854_v63, 0.0  ;;  %v4856_v28 = vpop.eup %4855 }
 0x7c3   :  { %v3582_v30 = vmul.f32 1.442695, %v5365_v23  ;;  %3602 = vadd.xlane.f32.xlu1 %v3601_v26  ;;  %3593 = vadd.xlane.f32.xlu0 %v3592_v27  ;;  %v3522_v31 = vpop.xlane.xlu0 %3521  ;;  %v3595_v1 = vsel %vm3495_vm1, %v4856_v28, 0.0 }
 0x7c4   :  { %4865 = vpow2.f32 %v3580_v25  ;;  %v5372_v32 = vsub.f32 %v5302_v2, %v3522_v31  ;;  %v3525_v33 = vpop.xlane.xlu1 %3524 }
 0x7c5   :  { %4867 = vpow2.f32 %v3582_v30  ;;  %v5375_v39 = vsub.f32 %v5304_v45, %v3525_v33 }
 0x7c6   :  { %v4858_v40 = vpop.eup %4857  ;;  %v3576_v0 = vmul.f32 1.442695, %v5372_v32 }
 0x7c7   :  { %v4860_v41 = vpop.eup %4859  ;;  %v3578_v42 = vmul.f32 1.442695, %v5375_v39  ;;  %3596 = vadd.xlane.f32.xlu1 %v3595_v1  ;;  %v3534_v43 = vpop.xlane.xlu0 %3533  ;;  %v3610_v4 = vsel %vm3495_vm1, %v4858_v40, 0.0 }
 0x7c8   :  { %4869 = vpow2.f32 %v3576_v0  ;;  %v5382_v2 = vsub.f32 %v5312_v7, %v3534_v43  ;;  %3611 = vadd.xlane.f32.xlu0 %v3610_v4  ;;  %v3613_v6 = vsel %vm3495_vm1, %v4860_v41, 0.0 }
 0x7c9   :  { %4871 = vpow2.f32 %v3578_v42  ;;  %v3537_v45 = vpop.xlane.xlu1 %3536 }
 0x7ca   :  { %v4862_v46 = vpop.eup %4861  ;;  %v3584_v5 = vmul.f32 1.442695, %v5382_v2  ;;  %v5386_v47 = vsub.f32 %v5316_v9, %v3537_v45 }
 0x7cb   :  { %v4864_v8 = vpop.eup %4863  ;;  %3614 = vadd.xlane.f32.xlu1 %v3613_v6  ;;  %v3540_v44 = vpop.xlane.xlu0 %3539  ;;  %v3604_v3 = vsel %vm3495_vm1, %v4862_v46, 0.0 }
 0x7cc   :  { %4873 = vpow2.f32 %v3584_v5  ;;  %v3586_v7 = vmul.f32 1.442695, %v5386_v47  ;;  %v5392_v48 = vsub.f32 %v5314_v49, %v3540_v44  ;;  %3605 = vadd.xlane.f32.xlu0 %v3604_v3  ;;  %v3607_v52 = vsel %vm3495_vm1, %v4864_v8, 0.0 }
 0x7cd   :  { %v3543_v10 = vpop.xlane.xlu1 %3542 }
 0x7ce   :  { %v4866_v11 = vpop.eup %4865  ;;  %4875 = vpow2.f32 %v3586_v7  ;;  %v3588_v9 = vmul.f32 1.442695, %v5392_v48  ;;  %v5396_v51 = vsub.f32 %v5320_v50, %v3543_v10 }
 0x7cf   :  { %v4868_v60 = vpop.eup %4867  ;;  %3608 = vadd.xlane.f32.xlu1 %v3607_v52  ;;  %v3622_v14 = vsel %vm3495_vm1, %v4866_v11, 0.0 }
 0x7d0   :  { %4877 = vpow2.f32 %v3588_v9  ;;  %v3590_v53 = vmul.f32 1.442695, %v5396_v51  ;;  %3623 = vadd.xlane.f32.xlu0 %v3622_v14  ;;  %v3625_v54 = vsel %vm3495_vm1, %v4868_v60, 0.0 }
 0x7d2   :  { %v4870_v49 = vpop.eup %4869  ;;  %4879 = vpow2.f32 %v3590_v53 }
 0x7d3   :  { %v4872_v17 = vpop.eup %4871  ;;  %3626 = vadd.xlane.f32.xlu1 %v3625_v54  ;;  %v3616_v55 = vsel %vm3495_vm1, %v4870_v49, 0.0 }
 0x7d4   :  { %3617 = vadd.xlane.f32.xlu0 %v3616_v55  ;;  %v3619_v18 = vsel %vm3495_vm1, %v4872_v17, 0.0 }
 0x7d6   :  { %v4874_v50 = vpop.eup %4873 }
 0x7d7   :  { %3620 = vadd.xlane.f32.xlu1 %v3619_v18  ;;  %v3628_v19 = vsel %vm3495_vm1, %v4874_v50, 0.0 }
 0x7d8   :  { %v4876_v57 = vpop.eup %4875  ;;  %3629 = vadd.xlane.f32.xlu0 %v3628_v19 }
 0x7d9   :  { %v3631_v21 = vsel %vm3495_vm1, %v4876_v57, 0.0 }
 0x7da   :  { %v4878_v24 = vpop.eup %4877 }
 0x7db   :  { %3632 = vadd.xlane.f32.xlu1 %v3631_v21  ;;  %v3634_v34 = vsel %vm3495_vm1, %v4878_v24, 0.0 }
 0x7dc   :  { %v4880_v35 = vpop.eup %4879  ;;  %3635 = vadd.xlane.f32.xlu0 %v3634_v34 }
 0x7dd   :  { %v3637_v37 = vsel %vm3495_vm1, %v4880_v35, 0.0 }
 0x7df   :  { %3638 = vadd.xlane.f32.xlu1 %v3637_v37 }
 0x84c   :  { %v3600_v38 = vpop.xlane.xlu0 %3599 }
 0x84d   :  { %4881 = vlog2.f32 %v3600_v38 }
 0x850   :  { %v3603_v58 = vpop.xlane.xlu1 %3602  ;;  %v3594_v22 = vpop.xlane.xlu0 %3593 }
 0x851   :  { %4883 = vlog2.f32 %v3603_v58 }
 0x852   :  { %4885 = vlog2.f32 %v3594_v22 }
 0x854   :  { %v3597_v59 = vpop.xlane.xlu1 %3596 }
 0x855   :  { %4887 = vlog2.f32 %v3597_v59  ;;  %v3612_v62 = vpop.xlane.xlu0 %3611 }
 0x856   :  { %4889 = vlog2.f32 %v3612_v62 }
 0x857   :  { %v4882_v63 = vpop.eup %4881 }
 0x858   :  { %v3645_v25 = vmul.f32 0.6931472, %v4882_v63  ;;  %v3615_v26 = vpop.xlane.xlu1 %3614 }
 0x859   :  { %4891 = vlog2.f32 %v3615_v26  ;;  %v3606_v27 = vpop.xlane.xlu0 %3605 }
 0x85a   :  { %v3674_v28 = vsub.f32 %v5329_v12, %v3645_v25  ;;  %4893 = vlog2.f32 %v3606_v27 }
 0x85b   :  { %v4884_v30 = vpop.eup %4883 }
 0x85c   :  { %v4886_v31 = vpop.eup %4885  ;;  %3690 = vst.msk [vmem:[%s5496_s8 + $0x10] sm:$0xff] %vm3495_vm1, %v3674_v28  ;;  %v3647_v33 = vmul.f32 0.6931472, %v4884_v30  ;;  %v3609_v40 = vpop.xlane.xlu1 %3608 }
 0x85d   :  { %v3641_v0 = vmul.f32 0.6931472, %v4886_v31  ;;  %4895 = vlog2.f32 %v3609_v40  ;;  %v3624_v1 = vpop.xlane.xlu0 %3623 }
 0x85e   :  { %v3675_v41 = vsub.f32 %v5337_v15, %v3647_v33  ;;  %4897 = vlog2.f32 %v3624_v1 }
 0x85f   :  { %v4888_v42 = vpop.eup %4887  ;;  %v3672_v43 = vsub.f32 %v5332_v13, %v3641_v0 }
 0x860   :  { %v4890_v12 = vpop.eup %4889  ;;  %3691 = vst.msk [vmem:[%s5496_s8 + $0x18] sm:$0xff] %vm3495_vm1, %v3675_v41  ;;  %v3643_v4 = vmul.f32 0.6931472, %v4888_v42  ;;  %v3627_v45 = vpop.xlane.xlu1 %3626 }
 0x861   :  { %3688 = vst.msk [vmem:[%s5496_s8] sm:$0xff] %vm3495_vm1, %v3672_v43  ;;  %v3653_v46 = vmul.f32 0.6931472, %v4890_v12  ;;  %4899 = vlog2.f32 %v3627_v45  ;;  %v3618_v15 = vpop.xlane.xlu0 %3617 }
 0x862   :  { %v3673_v5 = vsub.f32 %v5340_v16, %v3643_v4  ;;  %4901 = vlog2.f32 %v3618_v15 }
 0x863   :  { %v4892_v13 = vpop.eup %4891  ;;  %v3678_v6 = vsub.f32 %v5345_v56, %v3653_v46 }
 0x864   :  { %v4894_v8 = vpop.eup %4893  ;;  %3689 = vst.msk [vmem:[%s5496_s8 + $0x8] sm:$0xff] %vm3495_vm1, %v3673_v5  ;;  %v3655_v44 = vmul.f32 0.6931472, %v4892_v13  ;;  %v3621_v3 = vpop.xlane.xlu1 %3620 }
 0x865   :  { %3694 = vst.msk [vmem:[%s5496_s8 + $0x30] sm:$0xff] %vm3495_vm1, %v3678_v6  ;;  %v3649_v7 = vmul.f32 0.6931472, %v4894_v8  ;;  %4903 = vlog2.f32 %v3621_v3  ;;  %v3630_v16 = vpop.xlane.xlu0 %3629 }
 0x866   :  { %v3679_v10 = vsub.f32 %v5348_v20, %v3655_v44  ;;  %4905 = vlog2.f32 %v3630_v16 }
 0x867   :  { %v4896_v56 = vpop.eup %4895  ;;  %v3676_v11 = vsub.f32 %v5353_v29, %v3649_v7 }
 0x868   :  { %v4898_v9 = vpop.eup %4897  ;;  %3695 = vst.msk [vmem:[%s5496_s8 + $0x38] sm:$0xff] %vm3495_vm1, %v3679_v10  ;;  %v3651_v52 = vmul.f32 0.6931472, %v4896_v56  ;;  %v3633_v60 = vpop.xlane.xlu1 %3632 }
 0x869   :  { %3692 = vst.msk [vmem:[%s5496_s8 + $0x20] sm:$0xff] %vm3495_vm1, %v3676_v11  ;;  %v3661_v14 = vmul.f32 0.6931472, %v4898_v9  ;;  %4907 = vlog2.f32 %v3633_v60  ;;  %v3636_v20 = vpop.xlane.xlu0 %3635 }
 0x86a   :  { %v3677_v53 = vsub.f32 %v5356_v36, %v3651_v52  ;;  %4909 = vlog2.f32 %v3636_v20 }
 0x86b   :  { %v4900_v29 = vpop.eup %4899  ;;  %v3682_v49 = vsub.f32 %v5362_v61, %v3661_v14 }
 0x86c   :  { %v4902_v54 = vpop.eup %4901  ;;  %3693 = vst.msk [vmem:[%s5496_s8 + $0x28] sm:$0xff] %vm3495_vm1, %v3677_v53  ;;  %v3663_v17 = vmul.f32 0.6931472, %v4900_v29  ;;  %v3639_v55 = vpop.xlane.xlu1 %3638 }
 0x86d   :  { %3698 = vst.msk [vmem:[%s5496_s8 + $0x50] sm:$0xff] %vm3495_vm1, %v3682_v49  ;;  %v3657_v50 = vmul.f32 0.6931472, %v4902_v54  ;;  %4911 = vlog2.f32 %v3639_v55 }
 0x86e   :  { %v3683_v36 = vsub.f32 %v5365_v23, %v3663_v17 }
 0x86f   :  { %v4904_v18 = vpop.eup %4903  ;;  %v3680_v61 = vsub.f32 %v5372_v32, %v3657_v50 }
 0x870   :  { %v4906_v19 = vpop.eup %4905  ;;  %3699 = vst.msk [vmem:[%s5496_s8 + $0x58] sm:$0xff] %vm3495_vm1, %v3683_v36  ;;  %v3659_v57 = vmul.f32 0.6931472, %v4904_v18 }
 0x871   :  { %3696 = vst.msk [vmem:[%s5496_s8 + $0x40] sm:$0xff] %vm3495_vm1, %v3680_v61  ;;  %v3665_v21 = vmul.f32 0.6931472, %v4906_v19 }
 0x872   :  { %v3681_v24 = vsub.f32 %v5375_v39, %v3659_v57 }
 0x873   :  { %v4908_v34 = vpop.eup %4907  ;;  %v3684_v23 = vsub.f32 %v5382_v2, %v3665_v21 }
 0x874   :  { %v4910_v35 = vpop.eup %4909  ;;  %3697 = vst.msk [vmem:[%s5496_s8 + $0x48] sm:$0xff] %vm3495_vm1, %v3681_v24  ;;  %v3667_v32 = vmul.f32 0.6931472, %v4908_v34 }
 0x875   :  { %3700 = vst.msk [vmem:[%s5496_s8 + $0x60] sm:$0xff] %vm3495_vm1, %v3684_v23  ;;  %v3669_v37 = vmul.f32 0.6931472, %v4910_v35 }
 0x876   :  { %v3685_v38 = vsub.f32 %v5386_v47, %v3667_v32 }
 0x877   :  { %v4912_v58 = vpop.eup %4911  ;;  %v3686_v39 = vsub.f32 %v5392_v48, %v3669_v37 }
 0x878   :  { %3701 = vst.msk [vmem:[%s5496_s8 + $0x68] sm:$0xff] %vm3495_vm1, %v3685_v38  ;;  %v3671_v2 = vmul.f32 0.6931472, %v4912_v58 }
 0x879   :  { %3702 = vst.msk [vmem:[%s5496_s8 + $0x70] sm:$0xff] %vm3495_vm1, %v3686_v39 }
 0x87a   :  { %v3687_v22 = vsub.f32 %v5396_v51, %v3671_v2 }
 0x87c   :  { %3703 = vst.msk [vmem:[%s5496_s8 + $0x78] sm:$0xff] %vm3495_vm1, %v3687_v22 }
 0x87d   :  { %3708 = vsyncpa [#allocation4], 1 }
 0x87e   :  { %3709 = vsyncpa [#allocation6], 1 }

</bundles_post_ra>
